<compile_context>
chip_gen: v7x
topology: tpu7x:2x2x1
jax: 0.10.0
libtpu: 0.0.40
codegen_flags: <defaults>
</compile_context>

<pallas_src>
import numpy as np
import jax
import jax.numpy as jnp
from jax.experimental import pallas as pl
from jax.experimental.pallas import tpu as pltpu


# ----------------------------------------------------------------------------
# Kernel
# ----------------------------------------------------------------------------
def rhc_kernel(x2d_ref,        # VMEM (T*B, V)   : time series, time-major flat
               u_ref,          # VMEM (T*B, C)   : U[0,1) draws for Bernoulli
               wih_x_ref,      # VMEM (V, 4H)    : LSTM input->gates (X part, g cols *2)
               w_rec_ref,      # VMEM (H+C, 4H)  : [W_hh^T ; W_ih_y^T] fused (g cols *2)
               w_head_ref,     # VMEM (H, 2C)    : [W_out^T | W_ctl_state^T] fused
               consts_ref,     # VMEM (2+C+T, 4H): b_lstm / bout+eps / wctl_y / tbias
               yhat_ref,       # out VMEM (B, C)
               mhp_ref):       # out SMEM (1, 1)
    TB, V = x2d_ref.shape
    HC, H4 = w_rec_ref.shape
    H = H4 // 4
    C = HC - H
    T = consts_ref.shape[0] - 2 - C
    B = TB // T

    # ---- loop-invariant loads (hoisted out of the recurrence) --------------
    w_rec = w_rec_ref[...]
    w_head = w_head_ref[...]
    u_all = u_ref[...]
    consts = consts_ref[...]

    b_lstm = consts[0:1, :]                    # (1, 4H) combined LSTM bias (*g scaled)
    bout = consts[1:2, 0:C]                    # (1, C)  output-head bias
    eps = consts[1:2, C:C + 1]                 # (1, 1)  explore/exploit epsilon
    wctl_y = consts[2:2 + C, 0:C]              # (C, C)  controller y_hat weights
    tbias = consts[2 + C:2 + C + T, 0:C]       # (T, C)  t * w_ctl_t + b_ctl table

    # ---- hoisted input projection: one matmul for all T steps --------------
    xw = jnp.dot(x2d_ref[...], wih_x_ref[...],
                 preferred_element_type=jnp.float32) + b_lstm        # (T*B, 4H)

    # ---- carried state ------------------------------------------------------
    state = jnp.zeros((B, H + C), jnp.float32)     # [h | y_bar]
    c = jnp.zeros((B, H), jnp.float32)
    preds = jnp.zeros((B, C), jnp.float32)         # predictions
    halt = -jnp.ones((B, C), jnp.float32)          # halt_points
    last_yh = jnp.zeros((B, C), jnp.float32)       # y_hat of last executed step

    # Fully unrolled time loop: T static & small, all indices static.
    for t in range(T):
        # The torch loop breaks (at the bottom of the iteration) once
        # (halt_points == -1).sum() == 0; step t therefore executes iff some
        # halt entry is still -1 at its start.
        km = jnp.min(halt, keepdims=True)                              # (1,1)
        keep_hc = jnp.broadcast_to(km, (B, H + C)) < 0.0
        keep_h = jnp.broadcast_to(km, (B, H)) < 0.0
        keep_c = jnp.broadcast_to(km, (B, C)) < 0.0

        y_bar = state[:, H:H + C]

        # ---- LSTM cell: ONE fused recurrent matmul, ONE EUP pass -----------
        gates = xw[t * B:(t + 1) * B, :] + jnp.dot(
            state, w_rec, preferred_element_type=jnp.float32)          # (B, 4H)
        s = jax.nn.sigmoid(gates)          # single full-vreg transcendental
        i_g = s[:, 0:H]
        f_g = s[:, H:2 * H]
        g_g = 2.0 * s[:, 2 * H:3 * H] - 1.0   # tanh via pre-scaled sigmoid
        o_g = s[:, 3 * H:4 * H]
        c_new = f_g * c + i_g * g_g
        h_new = o_g * jnp.tanh(c_new)                                   # (B, H)

        # ---- fused output head + controller state term (one MXU op) --------
        oc = jnp.dot(h_new, w_head, preferred_element_type=jnp.float32)  # (B, 2C)
        y_hat = jax.nn.sigmoid(oc[:, 0:C] + bout)                        # (B, C)
        logits = (oc[:, C:2 * C]
                  + jnp.dot(y_hat, wctl_y, preferred_element_type=jnp.float32)
                  + tbias[t:t + 1, :])
        probs = jax.nn.sigmoid(logits)
        probs = (1.0 - eps) * probs + eps * 0.05

        # a_t ~ Bernoulli(probs) via precomputed uniforms
        a_t = u_all[t * B:(t + 1) * B, :] < probs                       # (B, C) bool

        # ---- halting-state updates -----------------------------------------
        preds_new = jnp.where(a_t & (preds == 0.0), y_hat, preds)
        ybar_new = jnp.where(a_t & (y_bar == 0.0), jnp.ones_like(y_bar), y_bar)
        halt_new = jnp.where((halt == -1.0) & a_t, jnp.float32(t), halt)
        state_new = jnp.concatenate([h_new, ybar_new], axis=1)          # (B, H+C)

        # apply updates only while the torch loop would still run
        state = jnp.where(keep_hc, state_new, state)
        c = jnp.where(keep_h, c_new, c)
        preds = jnp.where(keep_c, preds_new, preds)
        halt = jnp.where(keep_c, halt_new, halt)
        last_yh = jnp.where(keep_c, y_hat, last_yh)

    # y_hat = where(predictions == 0, y_hat_of_last_executed_step, predictions)
    y_final = jnp.where(preds == 0.0, last_yh, preds)
    # halt_points = where(halt_points == -1, time_of_last_step, halt_points)
    # (if the loop broke early there are no -1 entries left, so T-1 is exact)
    halt_final = jnp.where(halt == -1.0, jnp.float32(T - 1), halt)

    yhat_ref[...] = y_final
    mhp_ref[0, 0] = jnp.mean(1.0 + halt_final) / jnp.float32(T + 1)


# ----------------------------------------------------------------------------
# Wrapper (parameter plumbing / glue)
# ----------------------------------------------------------------------------
def exponential_decay(N, tau=1.0, tmax=7.0):
    t = np.linspace(0, tmax, N)
    return np.exp(-t / tau).astype(np.float32)


def init_rhc_params(key, ninp, nhid, nclasses):
    """Deterministic synthetic parameters, PyTorch-shaped."""
    ks = jax.random.split(key, 8)

    def u(k, shape, fan_in):
        b = 1.0 / np.sqrt(fan_in)
        return jax.random.uniform(k, shape, jnp.float32, -b, b)

    H, C, V = nhid, nclasses, ninp
    return dict(
        w_ih=u(ks[0], (4 * H, V + C), H), b_ih=u(ks[1], (4 * H,), H),
        w_hh=u(ks[2], (4 * H, H), H),     b_hh=u(ks[3], (4 * H,), H),
        w_out=u(ks[4], (C, H), H),        b_out=u(ks[5], (C,), H),
        w_ctl=u(ks[6], (C, H + C + 1), H + C + 1),
        b_ctl=u(ks[7], (C,), H + C + 1),
    )


def rhc_forward(X, params, epoch, rng_key, nepochs=200, test=False):
    """Returns (y_hat [B, nclasses], mean_halting_point scalar)."""
    X = jnp.asarray(X, jnp.float32)
    T, B, V = X.shape
    C, H = params["w_out"].shape
    eps_val = 0.0 if test else float(exponential_decay(nepochs)[epoch])

    # torch layout -> kernel layout (transposed / fused, all host-side)
    wih_T = jnp.asarray(params["w_ih"], jnp.float32).T     # (V+C, 4H)
    wih_x = wih_T[:V]                                      # (V,  4H)
    wih_y = wih_T[V:]                                      # (C,  4H)
    whh_T = jnp.asarray(params["w_hh"], jnp.float32).T     # (H,  4H)
    b_lstm = (params["b_ih"] + params["b_hh"]).reshape(1, 4 * H).astype(jnp.float32)

    # Pre-scale the g-gate columns (2H:3H) by 2 so a single in-kernel sigmoid
    # covers all four gates: tanh(x) = 2*sigmoid(2x) - 1.
    g_scale = jnp.concatenate(
        [jnp.ones((1, 2 * H), jnp.float32),
         jnp.full((1, H), 2.0, jnp.float32),
         jnp.ones((1, H), jnp.float32)], axis=1)                      # (1, 4H)
    wih_x = wih_x * g_scale
    w_rec = jnp.concatenate([whh_T, wih_y], axis=0) * g_scale         # (H+C, 4H)
    b_lstm = b_lstm * g_scale

    wout_T = jnp.asarray(params["w_out"], jnp.float32).T   # (H, C)
    bout = jnp.asarray(params["b_out"], jnp.float32).reshape(1, C)
    wctl_T = jnp.asarray(params["w_ctl"], jnp.float32).T   # (H+C+1, C)
    wctl_s = wctl_T[:H]                                    # (H, C)
    wctl_y = wctl_T[H:H + C]                               # (C, C)
    wctl_t = wctl_T[H + C:H + C + 1]                       # (1, C)
    bctl = jnp.asarray(params["b_ctl"], jnp.float32).reshape(1, C)

    # fused output-head + controller-state weight and controller time table
    w_head = jnp.concatenate([wout_T, wctl_s], axis=1)                    # (H, 2C)
    tbias = jnp.arange(T, dtype=jnp.float32)[:, None] * wctl_t + bctl     # (T, C)

    # Pack all small constants + epsilon into ONE lane-padded VMEM buffer to
    # cut the pallas_call operand / DMA-descriptor count (6 inputs total).
    consts = jnp.zeros((2 + C + T, 4 * H), jnp.float32)
    consts = consts.at[0:1, :].set(b_lstm)
    consts = consts.at[1, 0:C].set(bout[0])
    consts = consts.at[1, C].set(jnp.float32(eps_val))
    consts = consts.at[2:2 + C, 0:C].set(wctl_y)
    consts = consts.at[2 + C:2 + C + T, 0:C].set(tbias)

    x2d = X.reshape(T * B, V)                                             # (T*B, V)
    uniforms = jax.random.uniform(rng_key, (T * B, C), jnp.float32)       # Bernoulli draws

    vmem = pl.BlockSpec(memory_space=pltpu.MemorySpace.VMEM)
    smem = pl.BlockSpec(memory_space=pltpu.MemorySpace.SMEM)

    y_hat, mhp = pl.pallas_call(
        rhc_kernel,
        out_shape=(
            jax.ShapeDtypeStruct((B, C), jnp.float32),
            jax.ShapeDtypeStruct((1, 1), jnp.float32),
        ),
        in_specs=[vmem] * 6,
        out_specs=(vmem, smem),
    )(x2d, uniforms, wih_x, w_rec, w_head, consts)
    return y_hat, mhp[0, 0]


# ----------------------------------------------------------------------------
if __name__ == "__main__":
    # Small shapes consistent with the module: X is (T, B, V).
    T, B, V = 8, 8, 16
    nhid, nclasses, nepochs = 32, 4, 200

    key = jax.random.PRNGKey(0)
    kx, kp, ku = jax.random.split(key, 3)
    X = jax.random.normal(kx, (T, B, V), jnp.float32)
    params = init_rhc_params(kp, V, nhid, nclasses)

    y_hat, mean_halting_point = rhc_forward(
        X, params, epoch=0, rng_key=ku, nepochs=nepochs, test=True)
    y_hat = jax.block_until_ready(y_hat)
    mean_halting_point = jax.block_until_ready(mean_halting_point)

    assert y_hat.shape == (B, nclasses)
    assert np.all(np.isfinite(np.asarray(y_hat)))
    assert np.isfinite(float(mean_halting_point))
    print("KERNEL_OK")
</pallas_src>

<mosaic_0001>
module attributes {stable_mosaic.version = 11 : i64} {
  func.func @rhc_kernel(%arg0: memref<64x16xf32, #tpu.memory_space<vmem>>, %arg1: memref<64x4xf32, #tpu.memory_space<vmem>>, %arg2: memref<16x128xf32, #tpu.memory_space<vmem>>, %arg3: memref<36x128xf32, #tpu.memory_space<vmem>>, %arg4: memref<32x8xf32, #tpu.memory_space<vmem>>, %arg5: memref<14x128xf32, #tpu.memory_space<vmem>>, %arg6: memref<8x4xf32, #tpu.memory_space<vmem>>, %arg7: memref<1x1xf32, #tpu.memory_space<smem>>) attributes {dimension_semantics = [], scalar_prefetch = 0 : i64, scratch_operands = 0 : i64, tpu.core_type = #tpu.core_type<tc>} {
    %c0 = arith.constant 0 : index
    %c0_0 = arith.constant 0 : index
    %0 = vector.load %arg3[%c0, %c0_0] : memref<36x128xf32, #tpu.memory_space<vmem>>, vector<36x128xf32>
    %c0_1 = arith.constant 0 : index
    %c0_2 = arith.constant 0 : index
    %1 = vector.load %arg4[%c0_1, %c0_2] : memref<32x8xf32, #tpu.memory_space<vmem>>, vector<32x8xf32>
    %c0_3 = arith.constant 0 : index
    %c0_4 = arith.constant 0 : index
    %2 = vector.load %arg1[%c0_3, %c0_4] : memref<64x4xf32, #tpu.memory_space<vmem>>, vector<64x4xf32>
    %c0_5 = arith.constant 0 : index
    %c0_6 = arith.constant 0 : index
    %3 = vector.load %arg5[%c0_5, %c0_6] : memref<14x128xf32, #tpu.memory_space<vmem>>, vector<14x128xf32>
    %4 = vector.extract_strided_slice %3 {offsets = [0, 0], sizes = [1, 128], strides = [1, 1]} : vector<14x128xf32> to vector<1x128xf32>
    %5 = vector.extract_strided_slice %3 {offsets = [1, 0], sizes = [1, 4], strides = [1, 1]} : vector<14x128xf32> to vector<1x4xf32>
    %6 = vector.extract_strided_slice %3 {offsets = [1, 4], sizes = [1, 1], strides = [1, 1]} : vector<14x128xf32> to vector<1x1xf32>
    %7 = vector.extract_strided_slice %3 {offsets = [2, 0], sizes = [4, 4], strides = [1, 1]} : vector<14x128xf32> to vector<4x4xf32>
    %8 = vector.extract_strided_slice %3 {offsets = [6, 0], sizes = [8, 4], strides = [1, 1]} : vector<14x128xf32> to vector<8x4xf32>
    %c0_7 = arith.constant 0 : index
    %c0_8 = arith.constant 0 : index
    %9 = vector.load %arg0[%c0_7, %c0_8] : memref<64x16xf32, #tpu.memory_space<vmem>>, vector<64x16xf32>
    %c0_9 = arith.constant 0 : index
    %c0_10 = arith.constant 0 : index
    %10 = vector.load %arg2[%c0_9, %c0_10] : memref<16x128xf32, #tpu.memory_space<vmem>>, vector<16x128xf32>
    %cst = arith.constant dense<0.000000e+00> : vector<64x128xf32>
    %11 = tpu.matmul %9, %10, %cst {dimension_numbers = #tpu.dot_dimension_numbers<[1], [0], [0], [1], [0, 0, 1, 1], [], []>} : vector<64x16xf32>, vector<16x128xf32>, vector<64x128xf32> -> vector<64x128xf32>
    %12 = vector.broadcast %4 : vector<1x128xf32> to vector<64x128xf32>
    %13 = arith.addf %11, %12 : vector<64x128xf32>
    %cst_11 = arith.constant 0.000000e+00 : f32
    %14 = vector.broadcast %cst_11 : f32 to vector<8x36xf32>
    %cst_12 = arith.constant 0.000000e+00 : f32
    %15 = vector.broadcast %cst_12 : f32 to vector<8x32xf32>
    %cst_13 = arith.constant 0.000000e+00 : f32
    %16 = vector.broadcast %cst_13 : f32 to vector<8x4xf32>
    %cst_14 = arith.constant 1.000000e+00 : f32
    %17 = vector.broadcast %cst_14 : f32 to vector<8x4xf32>
    %cst_15 = arith.constant 0.000000e+00 : f32
    %18 = vector.broadcast %cst_15 : f32 to vector<8x4xf32>
    %19 = arith.subf %18, %17 : vector<8x4xf32>
    %cst_16 = arith.constant 0.000000e+00 : f32
    %20 = vector.broadcast %cst_16 : f32 to vector<8x4xf32>
    %21 = vector.shape_cast %19 : vector<8x4xf32> to vector<1x8x4xf32>
    %cst_17 = arith.constant dense<0x7F800000> : vector<1xf32>
    %22 = vector.multi_reduction <minimumf>, %21, %cst_17 [1, 2] : vector<1x8x4xf32> to vector<1xf32>
    %23 = vector.shape_cast %22 : vector<1xf32> to vector<1x1x1xf32>
    %24 = vector.extract %23[0, 0, 0] : f32 from vector<1x1x1xf32>
    %25 = vector.broadcast %24 : f32 to vector<1x1xf32>
    %26 = vector.shape_cast %25 : vector<1x1xf32> to vector<1x1xf32>
    %27 = vector.broadcast %26 : vector<1x1xf32> to vector<8x36xf32>
    %cst_18 = arith.constant 0.000000e+00 : f32
    %28 = vector.broadcast %cst_18 : f32 to vector<8x36xf32>
    %29 = arith.cmpf olt, %27, %28 : vector<8x36xf32>
    %30 = vector.shape_cast %25 : vector<1x1xf32> to vector<1x1xf32>
    %31 = vector.broadcast %30 : vector<1x1xf32> to vector<8x32xf32>
    %cst_19 = arith.constant 0.000000e+00 : f32
    %32 = vector.broadcast %cst_19 : f32 to vector<8x32xf32>
    %33 = arith.cmpf olt, %31, %32 : vector<8x32xf32>
    %34 = vector.shape_cast %25 : vector<1x1xf32> to vector<1x1xf32>
    %35 = vector.broadcast %34 : vector<1x1xf32> to vector<8x4xf32>
    %cst_20 = arith.constant 0.000000e+00 : f32
    %36 = vector.broadcast %cst_20 : f32 to vector<8x4xf32>
    %37 = arith.cmpf olt, %35, %36 : vector<8x4xf32>
    %38 = vector.extract_strided_slice %14 {offsets = [0, 32], sizes = [8, 4], strides = [1, 1]} : vector<8x36xf32> to vector<8x4xf32>
    %39 = vector.extract_strided_slice %13 {offsets = [0, 0], sizes = [8, 128], strides = [1, 1]} : vector<64x128xf32> to vector<8x128xf32>
    %cst_21 = arith.constant dense<0.000000e+00> : vector<8x128xf32>
    %40 = tpu.matmul %14, %0, %cst_21 {dimension_numbers = #tpu.dot_dimension_numbers<[1], [0], [0], [1], [0, 0, 1, 1], [], []>} : vector<8x36xf32>, vector<36x128xf32>, vector<8x128xf32> -> vector<8x128xf32>
    %41 = arith.addf %39, %40 : vector<8x128xf32>
    %42 = arith.negf %41 : vector<8x128xf32>
    %43 = math.exp %42 : vector<8x128xf32>
    %cst_22 = arith.constant 1.000000e+00 : f32
    %44 = vector.broadcast %cst_22 : f32 to vector<8x128xf32>
    %45 = arith.addf %44, %43 : vector<8x128xf32>
    %46 = arith.divf %44, %45 : vector<8x128xf32>
    %47 = vector.extract_strided_slice %46 {offsets = [0, 0], sizes = [8, 32], strides = [1, 1]} : vector<8x128xf32> to vector<8x32xf32>
    %48 = vector.extract_strided_slice %46 {offsets = [0, 32], sizes = [8, 32], strides = [1, 1]} : vector<8x128xf32> to vector<8x32xf32>
    %49 = vector.extract_strided_slice %46 {offsets = [0, 64], sizes = [8, 32], strides = [1, 1]} : vector<8x128xf32> to vector<8x32xf32>
    %cst_23 = arith.constant 2.000000e+00 : f32
    %50 = vector.broadcast %cst_23 : f32 to vector<8x32xf32>
    %51 = arith.mulf %50, %49 : vector<8x32xf32>
    %cst_24 = arith.constant 1.000000e+00 : f32
    %52 = vector.broadcast %cst_24 : f32 to vector<8x32xf32>
    %53 = arith.subf %51, %52 : vector<8x32xf32>
    %54 = vector.extract_strided_slice %46 {offsets = [0, 96], sizes = [8, 32], strides = [1, 1]} : vector<8x128xf32> to vector<8x32xf32>
    %55 = arith.mulf %48, %15 : vector<8x32xf32>
    %56 = arith.mulf %47, %53 : vector<8x32xf32>
    %57 = arith.addf %55, %56 : vector<8x32xf32>
    %58 = math.tanh %57 : vector<8x32xf32>
    %59 = arith.mulf %54, %58 : vector<8x32xf32>
    %cst_25 = arith.constant dense<0.000000e+00> : vector<8x8xf32>
    %60 = tpu.matmul %59, %1, %cst_25 {dimension_numbers = #tpu.dot_dimension_numbers<[1], [0], [0], [1], [0, 0, 1, 1], [], []>} : vector<8x32xf32>, vector<32x8xf32>, vector<8x8xf32> -> vector<8x8xf32>
    %61 = vector.extract_strided_slice %60 {offsets = [0, 0], sizes = [8, 4], strides = [1, 1]} : vector<8x8xf32> to vector<8x4xf32>
    %62 = vector.broadcast %5 : vector<1x4xf32> to vector<8x4xf32>
    %63 = arith.addf %61, %62 : vector<8x4xf32>
    %64 = arith.negf %63 : vector<8x4xf32>
    %65 = math.exp %64 : vector<8x4xf32>
    %cst_26 = arith.constant 1.000000e+00 : f32
    %66 = vector.broadcast %cst_26 : f32 to vector<8x4xf32>
    %67 = arith.addf %66, %65 : vector<8x4xf32>
    %68 = arith.divf %66, %67 : vector<8x4xf32>
    %69 = vector.extract_strided_slice %60 {offsets = [0, 4], sizes = [8, 4], strides = [1, 1]} : vector<8x8xf32> to vector<8x4xf32>
    %cst_27 = arith.constant dense<0.000000e+00> : vector<8x4xf32>
    %70 = tpu.matmul %68, %7, %cst_27 {dimension_numbers = #tpu.dot_dimension_numbers<[1], [0], [0], [1], [0, 0, 1, 1], [], []>} : vector<8x4xf32>, vector<4x4xf32>, vector<8x4xf32> -> vector<8x4xf32>
    %71 = arith.addf %69, %70 : vector<8x4xf32>
    %72 = vector.extract_strided_slice %8 {offsets = [0, 0], sizes = [1, 4], strides = [1, 1]} : vector<8x4xf32> to vector<1x4xf32>
    %73 = vector.broadcast %72 : vector<1x4xf32> to vector<8x4xf32>
    %74 = arith.addf %71, %73 : vector<8x4xf32>
    %75 = arith.negf %74 : vector<8x4xf32>
    %76 = math.exp %75 : vector<8x4xf32>
    %cst_28 = arith.constant 1.000000e+00 : f32
    %77 = vector.broadcast %cst_28 : f32 to vector<8x4xf32>
    %78 = arith.addf %77, %76 : vector<8x4xf32>
    %79 = arith.divf %77, %78 : vector<8x4xf32>
    %cst_29 = arith.constant 1.000000e+00 : f32
    %80 = vector.broadcast %cst_29 : f32 to vector<1x1xf32>
    %81 = arith.subf %80, %6 : vector<1x1xf32>
    %82 = vector.broadcast %81 : vector<1x1xf32> to vector<8x4xf32>
    %83 = arith.mulf %82, %79 : vector<8x4xf32>
    %cst_30 = arith.constant 5.000000e-02 : f32
    %84 = vector.broadcast %cst_30 : f32 to vector<1x1xf32>
    %85 = arith.mulf %6, %84 : vector<1x1xf32>
    %86 = vector.broadcast %85 : vector<1x1xf32> to vector<8x4xf32>
    %87 = arith.addf %83, %86 : vector<8x4xf32>
    %88 = vector.extract_strided_slice %2 {offsets = [0, 0], sizes = [8, 4], strides = [1, 1]} : vector<64x4xf32> to vector<8x4xf32>
    %89 = arith.cmpf olt, %88, %87 : vector<8x4xf32>
    %cst_31 = arith.constant 0.000000e+00 : f32
    %90 = vector.broadcast %cst_31 : f32 to vector<8x4xf32>
    %91 = arith.cmpf oeq, %16, %90 : vector<8x4xf32>
    %92 = arith.andi %89, %91 : vector<8x4xi1>
    %93 = arith.select %92, %68, %16 : vector<8x4xi1>, vector<8x4xf32>
    %cst_32 = arith.constant 0.000000e+00 : f32
    %94 = vector.broadcast %cst_32 : f32 to vector<8x4xf32>
    %95 = arith.cmpf oeq, %38, %94 : vector<8x4xf32>
    %96 = arith.andi %89, %95 : vector<8x4xi1>
    %cst_33 = arith.constant 1.000000e+00 : f32
    %97 = vector.broadcast %cst_33 : f32 to vector<8x4xf32>
    %98 = arith.select %96, %97, %38 : vector<8x4xi1>, vector<8x4xf32>
    %cst_34 = arith.constant -1.000000e+00 : f32
    %99 = vector.broadcast %cst_34 : f32 to vector<8x4xf32>
    %100 = arith.cmpf oeq, %19, %99 : vector<8x4xf32>
    %101 = arith.andi %100, %89 : vector<8x4xi1>
    %cst_35 = arith.constant 0.000000e+00 : f32
    %102 = vector.broadcast %cst_35 : f32 to vector<8x4xf32>
    %103 = arith.select %101, %102, %19 : vector<8x4xi1>, vector<8x4xf32>
    %104 = tpu.concatenate %59, %98 in 1 : vector<8x32xf32>, vector<8x4xf32> -> vector<8x36xf32>
    %105 = arith.select %29, %104, %14 : vector<8x36xi1>, vector<8x36xf32>
    %106 = arith.select %33, %57, %15 : vector<8x32xi1>, vector<8x32xf32>
    %107 = arith.select %37, %93, %16 : vector<8x4xi1>, vector<8x4xf32>
    %108 = arith.select %37, %103, %19 : vector<8x4xi1>, vector<8x4xf32>
    %109 = arith.select %37, %68, %20 : vector<8x4xi1>, vector<8x4xf32>
    %110 = vector.shape_cast %108 : vector<8x4xf32> to vector<1x8x4xf32>
    %cst_36 = arith.constant dense<0x7F800000> : vector<1xf32>
    %111 = vector.multi_reduction <minimumf>, %110, %cst_36 [1, 2] : vector<1x8x4xf32> to vector<1xf32>
    %112 = vector.shape_cast %111 : vector<1xf32> to vector<1x1x1xf32>
    %113 = vector.extract %112[0, 0, 0] : f32 from vector<1x1x1xf32>
    %114 = vector.broadcast %113 : f32 to vector<1x1xf32>
    %115 = vector.shape_cast %114 : vector<1x1xf32> to vector<1x1xf32>
    %116 = vector.broadcast %115 : vector<1x1xf32> to vector<8x36xf32>
    %cst_37 = arith.constant 0.000000e+00 : f32
    %117 = vector.broadcast %cst_37 : f32 to vector<8x36xf32>
    %118 = arith.cmpf olt, %116, %117 : vector<8x36xf32>
    %119 = vector.shape_cast %114 : vector<1x1xf32> to vector<1x1xf32>
    %120 = vector.broadcast %119 : vector<1x1xf32> to vector<8x32xf32>
    %cst_38 = arith.constant 0.000000e+00 : f32
    %121 = vector.broadcast %cst_38 : f32 to vector<8x32xf32>
    %122 = arith.cmpf olt, %120, %121 : vector<8x32xf32>
    %123 = vector.shape_cast %114 : vector<1x1xf32> to vector<1x1xf32>
    %124 = vector.broadcast %123 : vector<1x1xf32> to vector<8x4xf32>
    %cst_39 = arith.constant 0.000000e+00 : f32
    %125 = vector.broadcast %cst_39 : f32 to vector<8x4xf32>
    %126 = arith.cmpf olt, %124, %125 : vector<8x4xf32>
    %127 = vector.extract_strided_slice %105 {offsets = [0, 32], sizes = [8, 4], strides = [1, 1]} : vector<8x36xf32> to vector<8x4xf32>
    %128 = vector.extract_strided_slice %13 {offsets = [8, 0], sizes = [8, 128], strides = [1, 1]} : vector<64x128xf32> to vector<8x128xf32>
    %cst_40 = arith.constant dense<0.000000e+00> : vector<8x128xf32>
    %129 = tpu.matmul %105, %0, %cst_40 {dimension_numbers = #tpu.dot_dimension_numbers<[1], [0], [0], [1], [0, 0, 1, 1], [], []>} : vector<8x36xf32>, vector<36x128xf32>, vector<8x128xf32> -> vector<8x128xf32>
    %130 = arith.addf %128, %129 : vector<8x128xf32>
    %131 = arith.negf %130 : vector<8x128xf32>
    %132 = math.exp %131 : vector<8x128xf32>
    %cst_41 = arith.constant 1.000000e+00 : f32
    %133 = vector.broadcast %cst_41 : f32 to vector<8x128xf32>
    %134 = arith.addf %133, %132 : vector<8x128xf32>
    %135 = arith.divf %133, %134 : vector<8x128xf32>
    %136 = vector.extract_strided_slice %135 {offsets = [0, 0], sizes = [8, 32], strides = [1, 1]} : vector<8x128xf32> to vector<8x32xf32>
    %137 = vector.extract_strided_slice %135 {offsets = [0, 32], sizes = [8, 32], strides = [1, 1]} : vector<8x128xf32> to vector<8x32xf32>
    %138 = vector.extract_strided_slice %135 {offsets = [0, 64], sizes = [8, 32], strides = [1, 1]} : vector<8x128xf32> to vector<8x32xf32>
    %cst_42 = arith.constant 2.000000e+00 : f32
    %139 = vector.broadcast %cst_42 : f32 to vector<8x32xf32>
    %140 = arith.mulf %139, %138 : vector<8x32xf32>
    %cst_43 = arith.constant 1.000000e+00 : f32
    %141 = vector.broadcast %cst_43 : f32 to vector<8x32xf32>
    %142 = arith.subf %140, %141 : vector<8x32xf32>
    %143 = vector.extract_strided_slice %135 {offsets = [0, 96], sizes = [8, 32], strides = [1, 1]} : vector<8x128xf32> to vector<8x32xf32>
    %144 = arith.mulf %137, %106 : vector<8x32xf32>
    %145 = arith.mulf %136, %142 : vector<8x32xf32>
    %146 = arith.addf %144, %145 : vector<8x32xf32>
    %147 = math.tanh %146 : vector<8x32xf32>
    %148 = arith.mulf %143, %147 : vector<8x32xf32>
    %cst_44 = arith.constant dense<0.000000e+00> : vector<8x8xf32>
    %149 = tpu.matmul %148, %1, %cst_44 {dimension_numbers = #tpu.dot_dimension_numbers<[1], [0], [0], [1], [0, 0, 1, 1], [], []>} : vector<8x32xf32>, vector<32x8xf32>, vector<8x8xf32> -> vector<8x8xf32>
    %150 = vector.extract_strided_slice %149 {offsets = [0, 0], sizes = [8, 4], strides = [1, 1]} : vector<8x8xf32> to vector<8x4xf32>
    %151 = vector.broadcast %5 : vector<1x4xf32> to vector<8x4xf32>
    %152 = arith.addf %150, %151 : vector<8x4xf32>
    %153 = arith.negf %152 : vector<8x4xf32>
    %154 = math.exp %153 : vector<8x4xf32>
    %cst_45 = arith.constant 1.000000e+00 : f32
    %155 = vector.broadcast %cst_45 : f32 to vector<8x4xf32>
    %156 = arith.addf %155, %154 : vector<8x4xf32>
    %157 = arith.divf %155, %156 : vector<8x4xf32>
    %158 = vector.extract_strided_slice %149 {offsets = [0, 4], sizes = [8, 4], strides = [1, 1]} : vector<8x8xf32> to vector<8x4xf32>
    %cst_46 = arith.constant dense<0.000000e+00> : vector<8x4xf32>
    %159 = tpu.matmul %157, %7, %cst_46 {dimension_numbers = #tpu.dot_dimension_numbers<[1], [0], [0], [1], [0, 0, 1, 1], [], []>} : vector<8x4xf32>, vector<4x4xf32>, vector<8x4xf32> -> vector<8x4xf32>
    %160 = arith.addf %158, %159 : vector<8x4xf32>
    %161 = vector.extract_strided_slice %8 {offsets = [1, 0], sizes = [1, 4], strides = [1, 1]} : vector<8x4xf32> to vector<1x4xf32>
    %162 = vector.broadcast %161 : vector<1x4xf32> to vector<8x4xf32>
    %163 = arith.addf %160, %162 : vector<8x4xf32>
    %164 = arith.negf %163 : vector<8x4xf32>
    %165 = math.exp %164 : vector<8x4xf32>
    %cst_47 = arith.constant 1.000000e+00 : f32
    %166 = vector.broadcast %cst_47 : f32 to vector<8x4xf32>
    %167 = arith.addf %166, %165 : vector<8x4xf32>
    %168 = arith.divf %166, %167 : vector<8x4xf32>
    %cst_48 = arith.constant 1.000000e+00 : f32
    %169 = vector.broadcast %cst_48 : f32 to vector<1x1xf32>
    %170 = arith.subf %169, %6 : vector<1x1xf32>
    %171 = vector.broadcast %170 : vector<1x1xf32> to vector<8x4xf32>
    %172 = arith.mulf %171, %168 : vector<8x4xf32>
    %cst_49 = arith.constant 5.000000e-02 : f32
    %173 = vector.broadcast %cst_49 : f32 to vector<1x1xf32>
    %174 = arith.mulf %6, %173 : vector<1x1xf32>
    %175 = vector.broadcast %174 : vector<1x1xf32> to vector<8x4xf32>
    %176 = arith.addf %172, %175 : vector<8x4xf32>
    %177 = vector.extract_strided_slice %2 {offsets = [8, 0], sizes = [8, 4], strides = [1, 1]} : vector<64x4xf32> to vector<8x4xf32>
    %178 = arith.cmpf olt, %177, %176 : vector<8x4xf32>
    %cst_50 = arith.constant 0.000000e+00 : f32
    %179 = vector.broadcast %cst_50 : f32 to vector<8x4xf32>
    %180 = arith.cmpf oeq, %107, %179 : vector<8x4xf32>
    %181 = arith.andi %178, %180 : vector<8x4xi1>
    %182 = arith.select %181, %157, %107 : vector<8x4xi1>, vector<8x4xf32>
    %cst_51 = arith.constant 0.000000e+00 : f32
    %183 = vector.broadcast %cst_51 : f32 to vector<8x4xf32>
    %184 = arith.cmpf oeq, %127, %183 : vector<8x4xf32>
    %185 = arith.andi %178, %184 : vector<8x4xi1>
    %cst_52 = arith.constant 1.000000e+00 : f32
    %186 = vector.broadcast %cst_52 : f32 to vector<8x4xf32>
    %187 = arith.select %185, %186, %127 : vector<8x4xi1>, vector<8x4xf32>
    %cst_53 = arith.constant -1.000000e+00 : f32
    %188 = vector.broadcast %cst_53 : f32 to vector<8x4xf32>
    %189 = arith.cmpf oeq, %108, %188 : vector<8x4xf32>
    %190 = arith.andi %189, %178 : vector<8x4xi1>
    %cst_54 = arith.constant 1.000000e+00 : f32
    %191 = vector.broadcast %cst_54 : f32 to vector<8x4xf32>
    %192 = arith.select %190, %191, %108 : vector<8x4xi1>, vector<8x4xf32>
    %193 = tpu.concatenate %148, %187 in 1 : vector<8x32xf32>, vector<8x4xf32> -> vector<8x36xf32>
    %194 = arith.select %118, %193, %105 : vector<8x36xi1>, vector<8x36xf32>
    %195 = arith.select %122, %146, %106 : vector<8x32xi1>, vector<8x32xf32>
    %196 = arith.select %126, %182, %107 : vector<8x4xi1>, vector<8x4xf32>
    %197 = arith.select %126, %192, %108 : vector<8x4xi1>, vector<8x4xf32>
    %198 = arith.select %126, %157, %109 : vector<8x4xi1>, vector<8x4xf32>
    %199 = vector.shape_cast %197 : vector<8x4xf32> to vector<1x8x4xf32>
    %cst_55 = arith.constant dense<0x7F800000> : vector<1xf32>
    %200 = vector.multi_reduction <minimumf>, %199, %cst_55 [1, 2] : vector<1x8x4xf32> to vector<1xf32>
    %201 = vector.shape_cast %200 : vector<1xf32> to vector<1x1x1xf32>
    %202 = vector.extract %201[0, 0, 0] : f32 from vector<1x1x1xf32>
    %203 = vector.broadcast %202 : f32 to vector<1x1xf32>
    %204 = vector.shape_cast %203 : vector<1x1xf32> to vector<1x1xf32>
    %205 = vector.broadcast %204 : vector<1x1xf32> to vector<8x36xf32>
    %cst_56 = arith.constant 0.000000e+00 : f32
    %206 = vector.broadcast %cst_56 : f32 to vector<8x36xf32>
    %207 = arith.cmpf olt, %205, %206 : vector<8x36xf32>
    %208 = vector.shape_cast %203 : vector<1x1xf32> to vector<1x1xf32>
    %209 = vector.broadcast %208 : vector<1x1xf32> to vector<8x32xf32>
    %cst_57 = arith.constant 0.000000e+00 : f32
    %210 = vector.broadcast %cst_57 : f32 to vector<8x32xf32>
    %211 = arith.cmpf olt, %209, %210 : vector<8x32xf32>
    %212 = vector.shape_cast %203 : vector<1x1xf32> to vector<1x1xf32>
    %213 = vector.broadcast %212 : vector<1x1xf32> to vector<8x4xf32>
    %cst_58 = arith.constant 0.000000e+00 : f32
    %214 = vector.broadcast %cst_58 : f32 to vector<8x4xf32>
    %215 = arith.cmpf olt, %213, %214 : vector<8x4xf32>
    %216 = vector.extract_strided_slice %194 {offsets = [0, 32], sizes = [8, 4], strides = [1, 1]} : vector<8x36xf32> to vector<8x4xf32>
    %217 = vector.extract_strided_slice %13 {offsets = [16, 0], sizes = [8, 128], strides = [1, 1]} : vector<64x128xf32> to vector<8x128xf32>
    %cst_59 = arith.constant dense<0.000000e+00> : vector<8x128xf32>
    %218 = tpu.matmul %194, %0, %cst_59 {dimension_numbers = #tpu.dot_dimension_numbers<[1], [0], [0], [1], [0, 0, 1, 1], [], []>} : vector<8x36xf32>, vector<36x128xf32>, vector<8x128xf32> -> vector<8x128xf32>
    %219 = arith.addf %217, %218 : vector<8x128xf32>
    %220 = arith.negf %219 : vector<8x128xf32>
    %221 = math.exp %220 : vector<8x128xf32>
    %cst_60 = arith.constant 1.000000e+00 : f32
    %222 = vector.broadcast %cst_60 : f32 to vector<8x128xf32>
    %223 = arith.addf %222, %221 : vector<8x128xf32>
    %224 = arith.divf %222, %223 : vector<8x128xf32>
    %225 = vector.extract_strided_slice %224 {offsets = [0, 0], sizes = [8, 32], strides = [1, 1]} : vector<8x128xf32> to vector<8x32xf32>
    %226 = vector.extract_strided_slice %224 {offsets = [0, 32], sizes = [8, 32], strides = [1, 1]} : vector<8x128xf32> to vector<8x32xf32>
    %227 = vector.extract_strided_slice %224 {offsets = [0, 64], sizes = [8, 32], strides = [1, 1]} : vector<8x128xf32> to vector<8x32xf32>
    %cst_61 = arith.constant 2.000000e+00 : f32
    %228 = vector.broadcast %cst_61 : f32 to vector<8x32xf32>
    %229 = arith.mulf %228, %227 : vector<8x32xf32>
    %cst_62 = arith.constant 1.000000e+00 : f32
    %230 = vector.broadcast %cst_62 : f32 to vector<8x32xf32>
    %231 = arith.subf %229, %230 : vector<8x32xf32>
    %232 = vector.extract_strided_slice %224 {offsets = [0, 96], sizes = [8, 32], strides = [1, 1]} : vector<8x128xf32> to vector<8x32xf32>
    %233 = arith.mulf %226, %195 : vector<8x32xf32>
    %234 = arith.mulf %225, %231 : vector<8x32xf32>
    %235 = arith.addf %233, %234 : vector<8x32xf32>
    %236 = math.tanh %235 : vector<8x32xf32>
    %237 = arith.mulf %232, %236 : vector<8x32xf32>
    %cst_63 = arith.constant dense<0.000000e+00> : vector<8x8xf32>
    %238 = tpu.matmul %237, %1, %cst_63 {dimension_numbers = #tpu.dot_dimension_numbers<[1], [0], [0], [1], [0, 0, 1, 1], [], []>} : vector<8x32xf32>, vector<32x8xf32>, vector<8x8xf32> -> vector<8x8xf32>
    %239 = vector.extract_strided_slice %238 {offsets = [0, 0], sizes = [8, 4], strides = [1, 1]} : vector<8x8xf32> to vector<8x4xf32>
    %240 = vector.broadcast %5 : vector<1x4xf32> to vector<8x4xf32>
    %241 = arith.addf %239, %240 : vector<8x4xf32>
    %242 = arith.negf %241 : vector<8x4xf32>
    %243 = math.exp %242 : vector<8x4xf32>
    %cst_64 = arith.constant 1.000000e+00 : f32
    %244 = vector.broadcast %cst_64 : f32 to vector<8x4xf32>
    %245 = arith.addf %244, %243 : vector<8x4xf32>
    %246 = arith.divf %244, %245 : vector<8x4xf32>
    %247 = vector.extract_strided_slice %238 {offsets = [0, 4], sizes = [8, 4], strides = [1, 1]} : vector<8x8xf32> to vector<8x4xf32>
    %cst_65 = arith.constant dense<0.000000e+00> : vector<8x4xf32>
    %248 = tpu.matmul %246, %7, %cst_65 {dimension_numbers = #tpu.dot_dimension_numbers<[1], [0], [0], [1], [0, 0, 1, 1], [], []>} : vector<8x4xf32>, vector<4x4xf32>, vector<8x4xf32> -> vector<8x4xf32>
    %249 = arith.addf %247, %248 : vector<8x4xf32>
    %250 = vector.extract_strided_slice %8 {offsets = [2, 0], sizes = [1, 4], strides = [1, 1]} : vector<8x4xf32> to vector<1x4xf32>
    %251 = vector.broadcast %250 : vector<1x4xf32> to vector<8x4xf32>
    %252 = arith.addf %249, %251 : vector<8x4xf32>
    %253 = arith.negf %252 : vector<8x4xf32>
    %254 = math.exp %253 : vector<8x4xf32>
    %cst_66 = arith.constant 1.000000e+00 : f32
    %255 = vector.broadcast %cst_66 : f32 to vector<8x4xf32>
    %256 = arith.addf %255, %254 : vector<8x4xf32>
    %257 = arith.divf %255, %256 : vector<8x4xf32>
    %cst_67 = arith.constant 1.000000e+00 : f32
    %258 = vector.broadcast %cst_67 : f32 to vector<1x1xf32>
    %259 = arith.subf %258, %6 : vector<1x1xf32>
    %260 = vector.broadcast %259 : vector<1x1xf32> to vector<8x4xf32>
    %261 = arith.mulf %260, %257 : vector<8x4xf32>
    %cst_68 = arith.constant 5.000000e-02 : f32
    %262 = vector.broadcast %cst_68 : f32 to vector<1x1xf32>
    %263 = arith.mulf %6, %262 : vector<1x1xf32>
    %264 = vector.broadcast %263 : vector<1x1xf32> to vector<8x4xf32>
    %265 = arith.addf %261, %264 : vector<8x4xf32>
    %266 = vector.extract_strided_slice %2 {offsets = [16, 0], sizes = [8, 4], strides = [1, 1]} : vector<64x4xf32> to vector<8x4xf32>
    %267 = arith.cmpf olt, %266, %265 : vector<8x4xf32>
    %cst_69 = arith.constant 0.000000e+00 : f32
    %268 = vector.broadcast %cst_69 : f32 to vector<8x4xf32>
    %269 = arith.cmpf oeq, %196, %268 : vector<8x4xf32>
    %270 = arith.andi %267, %269 : vector<8x4xi1>
    %271 = arith.select %270, %246, %196 : vector<8x4xi1>, vector<8x4xf32>
    %cst_70 = arith.constant 0.000000e+00 : f32
    %272 = vector.broadcast %cst_70 : f32 to vector<8x4xf32>
    %273 = arith.cmpf oeq, %216, %272 : vector<8x4xf32>
    %274 = arith.andi %267, %273 : vector<8x4xi1>
    %cst_71 = arith.constant 1.000000e+00 : f32
    %275 = vector.broadcast %cst_71 : f32 to vector<8x4xf32>
    %276 = arith.select %274, %275, %216 : vector<8x4xi1>, vector<8x4xf32>
    %cst_72 = arith.constant -1.000000e+00 : f32
    %277 = vector.broadcast %cst_72 : f32 to vector<8x4xf32>
    %278 = arith.cmpf oeq, %197, %277 : vector<8x4xf32>
    %279 = arith.andi %278, %267 : vector<8x4xi1>
    %cst_73 = arith.constant 2.000000e+00 : f32
    %280 = vector.broadcast %cst_73 : f32 to vector<8x4xf32>
    %281 = arith.select %279, %280, %197 : vector<8x4xi1>, vector<8x4xf32>
    %282 = tpu.concatenate %237, %276 in 1 : vector<8x32xf32>, vector<8x4xf32> -> vector<8x36xf32>
    %283 = arith.select %207, %282, %194 : vector<8x36xi1>, vector<8x36xf32>
    %284 = arith.select %211, %235, %195 : vector<8x32xi1>, vector<8x32xf32>
    %285 = arith.select %215, %271, %196 : vector<8x4xi1>, vector<8x4xf32>
    %286 = arith.select %215, %281, %197 : vector<8x4xi1>, vector<8x4xf32>
    %287 = arith.select %215, %246, %198 : vector<8x4xi1>, vector<8x4xf32>
    %288 = vector.shape_cast %286 : vector<8x4xf32> to vector<1x8x4xf32>
    %cst_74 = arith.constant dense<0x7F800000> : vector<1xf32>
    %289 = vector.multi_reduction <minimumf>, %288, %cst_74 [1, 2] : vector<1x8x4xf32> to vector<1xf32>
    %290 = vector.shape_cast %289 : vector<1xf32> to vector<1x1x1xf32>
    %291 = vector.extract %290[0, 0, 0] : f32 from vector<1x1x1xf32>
    %292 = vector.broadcast %291 : f32 to vector<1x1xf32>
    %293 = vector.shape_cast %292 : vector<1x1xf32> to vector<1x1xf32>
    %294 = vector.broadcast %293 : vector<1x1xf32> to vector<8x36xf32>
    %cst_75 = arith.constant 0.000000e+00 : f32
    %295 = vector.broadcast %cst_75 : f32 to vector<8x36xf32>
    %296 = arith.cmpf olt, %294, %295 : vector<8x36xf32>
    %297 = vector.shape_cast %292 : vector<1x1xf32> to vector<1x1xf32>
    %298 = vector.broadcast %297 : vector<1x1xf32> to vector<8x32xf32>
    %cst_76 = arith.constant 0.000000e+00 : f32
    %299 = vector.broadcast %cst_76 : f32 to vector<8x32xf32>
    %300 = arith.cmpf olt, %298, %299 : vector<8x32xf32>
    %301 = vector.shape_cast %292 : vector<1x1xf32> to vector<1x1xf32>
    %302 = vector.broadcast %301 : vector<1x1xf32> to vector<8x4xf32>
    %cst_77 = arith.constant 0.000000e+00 : f32
    %303 = vector.broadcast %cst_77 : f32 to vector<8x4xf32>
    %304 = arith.cmpf olt, %302, %303 : vector<8x4xf32>
    %305 = vector.extract_strided_slice %283 {offsets = [0, 32], sizes = [8, 4], strides = [1, 1]} : vector<8x36xf32> to vector<8x4xf32>
    %306 = vector.extract_strided_slice %13 {offsets = [24, 0], sizes = [8, 128], strides = [1, 1]} : vector<64x128xf32> to vector<8x128xf32>
    %cst_78 = arith.constant dense<0.000000e+00> : vector<8x128xf32>
    %307 = tpu.matmul %283, %0, %cst_78 {dimension_numbers = #tpu.dot_dimension_numbers<[1], [0], [0], [1], [0, 0, 1, 1], [], []>} : vector<8x36xf32>, vector<36x128xf32>, vector<8x128xf32> -> vector<8x128xf32>
    %308 = arith.addf %306, %307 : vector<8x128xf32>
    %309 = arith.negf %308 : vector<8x128xf32>
    %310 = math.exp %309 : vector<8x128xf32>
    %cst_79 = arith.constant 1.000000e+00 : f32
    %311 = vector.broadcast %cst_79 : f32 to vector<8x128xf32>
    %312 = arith.addf %311, %310 : vector<8x128xf32>
    %313 = arith.divf %311, %312 : vector<8x128xf32>
    %314 = vector.extract_strided_slice %313 {offsets = [0, 0], sizes = [8, 32], strides = [1, 1]} : vector<8x128xf32> to vector<8x32xf32>
    %315 = vector.extract_strided_slice %313 {offsets = [0, 32], sizes = [8, 32], strides = [1, 1]} : vector<8x128xf32> to vector<8x32xf32>
    %316 = vector.extract_strided_slice %313 {offsets = [0, 64], sizes = [8, 32], strides = [1, 1]} : vector<8x128xf32> to vector<8x32xf32>
    %cst_80 = arith.constant 2.000000e+00 : f32
    %317 = vector.broadcast %cst_80 : f32 to vector<8x32xf32>
    %318 = arith.mulf %317, %316 : vector<8x32xf32>
    %cst_81 = arith.constant 1.000000e+00 : f32
    %319 = vector.broadcast %cst_81 : f32 to vector<8x32xf32>
    %320 = arith.subf %318, %319 : vector<8x32xf32>
    %321 = vector.extract_strided_slice %313 {offsets = [0, 96], sizes = [8, 32], strides = [1, 1]} : vector<8x128xf32> to vector<8x32xf32>
    %322 = arith.mulf %315, %284 : vector<8x32xf32>
    %323 = arith.mulf %314, %320 : vector<8x32xf32>
    %324 = arith.addf %322, %323 : vector<8x32xf32>
    %325 = math.tanh %324 : vector<8x32xf32>
    %326 = arith.mulf %321, %325 : vector<8x32xf32>
    %cst_82 = arith.constant dense<0.000000e+00> : vector<8x8xf32>
    %327 = tpu.matmul %326, %1, %cst_82 {dimension_numbers = #tpu.dot_dimension_numbers<[1], [0], [0], [1], [0, 0, 1, 1], [], []>} : vector<8x32xf32>, vector<32x8xf32>, vector<8x8xf32> -> vector<8x8xf32>
    %328 = vector.extract_strided_slice %327 {offsets = [0, 0], sizes = [8, 4], strides = [1, 1]} : vector<8x8xf32> to vector<8x4xf32>
    %329 = vector.broadcast %5 : vector<1x4xf32> to vector<8x4xf32>
    %330 = arith.addf %328, %329 : vector<8x4xf32>
    %331 = arith.negf %330 : vector<8x4xf32>
    %332 = math.exp %331 : vector<8x4xf32>
    %cst_83 = arith.constant 1.000000e+00 : f32
    %333 = vector.broadcast %cst_83 : f32 to vector<8x4xf32>
    %334 = arith.addf %333, %332 : vector<8x4xf32>
    %335 = arith.divf %333, %334 : vector<8x4xf32>
    %336 = vector.extract_strided_slice %327 {offsets = [0, 4], sizes = [8, 4], strides = [1, 1]} : vector<8x8xf32> to vector<8x4xf32>
    %cst_84 = arith.constant dense<0.000000e+00> : vector<8x4xf32>
    %337 = tpu.matmul %335, %7, %cst_84 {dimension_numbers = #tpu.dot_dimension_numbers<[1], [0], [0], [1], [0, 0, 1, 1], [], []>} : vector<8x4xf32>, vector<4x4xf32>, vector<8x4xf32> -> vector<8x4xf32>
    %338 = arith.addf %336, %337 : vector<8x4xf32>
    %339 = vector.extract_strided_slice %8 {offsets = [3, 0], sizes = [1, 4], strides = [1, 1]} : vector<8x4xf32> to vector<1x4xf32>
    %340 = vector.broadcast %339 : vector<1x4xf32> to vector<8x4xf32>
    %341 = arith.addf %338, %340 : vector<8x4xf32>
    %342 = arith.negf %341 : vector<8x4xf32>
    %343 = math.exp %342 : vector<8x4xf32>
    %cst_85 = arith.constant 1.000000e+00 : f32
    %344 = vector.broadcast %cst_85 : f32 to vector<8x4xf32>
    %345 = arith.addf %344, %343 : vector<8x4xf32>
    %346 = arith.divf %344, %345 : vector<8x4xf32>
    %cst_86 = arith.constant 1.000000e+00 : f32
    %347 = vector.broadcast %cst_86 : f32 to vector<1x1xf32>
    %348 = arith.subf %347, %6 : vector<1x1xf32>
    %349 = vector.broadcast %348 : vector<1x1xf32> to vector<8x4xf32>
    %350 = arith.mulf %349, %346 : vector<8x4xf32>
    %cst_87 = arith.constant 5.000000e-02 : f32
    %351 = vector.broadcast %cst_87 : f32 to vector<1x1xf32>
    %352 = arith.mulf %6, %351 : vector<1x1xf32>
    %353 = vector.broadcast %352 : vector<1x1xf32> to vector<8x4xf32>
    %354 = arith.addf %350, %353 : vector<8x4xf32>
    %355 = vector.extract_strided_slice %2 {offsets = [24, 0], sizes = [8, 4], strides = [1, 1]} : vector<64x4xf32> to vector<8x4xf32>
    %356 = arith.cmpf olt, %355, %354 : vector<8x4xf32>
    %cst_88 = arith.constant 0.000000e+00 : f32
    %357 = vector.broadcast %cst_88 : f32 to vector<8x4xf32>
    %358 = arith.cmpf oeq, %285, %357 : vector<8x4xf32>
    %359 = arith.andi %356, %358 : vector<8x4xi1>
    %360 = arith.select %359, %335, %285 : vector<8x4xi1>, vector<8x4xf32>
    %cst_89 = arith.constant 0.000000e+00 : f32
    %361 = vector.broadcast %cst_89 : f32 to vector<8x4xf32>
    %362 = arith.cmpf oeq, %305, %361 : vector<8x4xf32>
    %363 = arith.andi %356, %362 : vector<8x4xi1>
    %cst_90 = arith.constant 1.000000e+00 : f32
    %364 = vector.broadcast %cst_90 : f32 to vector<8x4xf32>
    %365 = arith.select %363, %364, %305 : vector<8x4xi1>, vector<8x4xf32>
    %cst_91 = arith.constant -1.000000e+00 : f32
    %366 = vector.broadcast %cst_91 : f32 to vector<8x4xf32>
    %367 = arith.cmpf oeq, %286, %366 : vector<8x4xf32>
    %368 = arith.andi %367, %356 : vector<8x4xi1>
    %cst_92 = arith.constant 3.000000e+00 : f32
    %369 = vector.broadcast %cst_92 : f32 to vector<8x4xf32>
    %370 = arith.select %368, %369, %286 : vector<8x4xi1>, vector<8x4xf32>
    %371 = tpu.concatenate %326, %365 in 1 : vector<8x32xf32>, vector<8x4xf32> -> vector<8x36xf32>
    %372 = arith.select %296, %371, %283 : vector<8x36xi1>, vector<8x36xf32>
    %373 = arith.select %300, %324, %284 : vector<8x32xi1>, vector<8x32xf32>
    %374 = arith.select %304, %360, %285 : vector<8x4xi1>, vector<8x4xf32>
    %375 = arith.select %304, %370, %286 : vector<8x4xi1>, vector<8x4xf32>
    %376 = arith.select %304, %335, %287 : vector<8x4xi1>, vector<8x4xf32>
    %377 = vector.shape_cast %375 : vector<8x4xf32> to vector<1x8x4xf32>
    %cst_93 = arith.constant dense<0x7F800000> : vector<1xf32>
    %378 = vector.multi_reduction <minimumf>, %377, %cst_93 [1, 2] : vector<1x8x4xf32> to vector<1xf32>
    %379 = vector.shape_cast %378 : vector<1xf32> to vector<1x1x1xf32>
    %380 = vector.extract %379[0, 0, 0] : f32 from vector<1x1x1xf32>
    %381 = vector.broadcast %380 : f32 to vector<1x1xf32>
    %382 = vector.shape_cast %381 : vector<1x1xf32> to vector<1x1xf32>
    %383 = vector.broadcast %382 : vector<1x1xf32> to vector<8x36xf32>
    %cst_94 = arith.constant 0.000000e+00 : f32
    %384 = vector.broadcast %cst_94 : f32 to vector<8x36xf32>
    %385 = arith.cmpf olt, %383, %384 : vector<8x36xf32>
    %386 = vector.shape_cast %381 : vector<1x1xf32> to vector<1x1xf32>
    %387 = vector.broadcast %386 : vector<1x1xf32> to vector<8x32xf32>
    %cst_95 = arith.constant 0.000000e+00 : f32
    %388 = vector.broadcast %cst_95 : f32 to vector<8x32xf32>
    %389 = arith.cmpf olt, %387, %388 : vector<8x32xf32>
    %390 = vector.shape_cast %381 : vector<1x1xf32> to vector<1x1xf32>
    %391 = vector.broadcast %390 : vector<1x1xf32> to vector<8x4xf32>
    %cst_96 = arith.constant 0.000000e+00 : f32
    %392 = vector.broadcast %cst_96 : f32 to vector<8x4xf32>
    %393 = arith.cmpf olt, %391, %392 : vector<8x4xf32>
    %394 = vector.extract_strided_slice %372 {offsets = [0, 32], sizes = [8, 4], strides = [1, 1]} : vector<8x36xf32> to vector<8x4xf32>
    %395 = vector.extract_strided_slice %13 {offsets = [32, 0], sizes = [8, 128], strides = [1, 1]} : vector<64x128xf32> to vector<8x128xf32>
    %cst_97 = arith.constant dense<0.000000e+00> : vector<8x128xf32>
    %396 = tpu.matmul %372, %0, %cst_97 {dimension_numbers = #tpu.dot_dimension_numbers<[1], [0], [0], [1], [0, 0, 1, 1], [], []>} : vector<8x36xf32>, vector<36x128xf32>, vector<8x128xf32> -> vector<8x128xf32>
    %397 = arith.addf %395, %396 : vector<8x128xf32>
    %398 = arith.negf %397 : vector<8x128xf32>
    %399 = math.exp %398 : vector<8x128xf32>
    %cst_98 = arith.constant 1.000000e+00 : f32
    %400 = vector.broadcast %cst_98 : f32 to vector<8x128xf32>
    %401 = arith.addf %400, %399 : vector<8x128xf32>
    %402 = arith.divf %400, %401 : vector<8x128xf32>
    %403 = vector.extract_strided_slice %402 {offsets = [0, 0], sizes = [8, 32], strides = [1, 1]} : vector<8x128xf32> to vector<8x32xf32>
    %404 = vector.extract_strided_slice %402 {offsets = [0, 32], sizes = [8, 32], strides = [1, 1]} : vector<8x128xf32> to vector<8x32xf32>
    %405 = vector.extract_strided_slice %402 {offsets = [0, 64], sizes = [8, 32], strides = [1, 1]} : vector<8x128xf32> to vector<8x32xf32>
    %cst_99 = arith.constant 2.000000e+00 : f32
    %406 = vector.broadcast %cst_99 : f32 to vector<8x32xf32>
    %407 = arith.mulf %406, %405 : vector<8x32xf32>
    %cst_100 = arith.constant 1.000000e+00 : f32
    %408 = vector.broadcast %cst_100 : f32 to vector<8x32xf32>
    %409 = arith.subf %407, %408 : vector<8x32xf32>
    %410 = vector.extract_strided_slice %402 {offsets = [0, 96], sizes = [8, 32], strides = [1, 1]} : vector<8x128xf32> to vector<8x32xf32>
    %411 = arith.mulf %404, %373 : vector<8x32xf32>
    %412 = arith.mulf %403, %409 : vector<8x32xf32>
    %413 = arith.addf %411, %412 : vector<8x32xf32>
    %414 = math.tanh %413 : vector<8x32xf32>
    %415 = arith.mulf %410, %414 : vector<8x32xf32>
    %cst_101 = arith.constant dense<0.000000e+00> : vector<8x8xf32>
    %416 = tpu.matmul %415, %1, %cst_101 {dimension_numbers = #tpu.dot_dimension_numbers<[1], [0], [0], [1], [0, 0, 1, 1], [], []>} : vector<8x32xf32>, vector<32x8xf32>, vector<8x8xf32> -> vector<8x8xf32>
    %417 = vector.extract_strided_slice %416 {offsets = [0, 0], sizes = [8, 4], strides = [1, 1]} : vector<8x8xf32> to vector<8x4xf32>
    %418 = vector.broadcast %5 : vector<1x4xf32> to vector<8x4xf32>
    %419 = arith.addf %417, %418 : vector<8x4xf32>
    %420 = arith.negf %419 : vector<8x4xf32>
    %421 = math.exp %420 : vector<8x4xf32>
    %cst_102 = arith.constant 1.000000e+00 : f32
    %422 = vector.broadcast %cst_102 : f32 to vector<8x4xf32>
    %423 = arith.addf %422, %421 : vector<8x4xf32>
    %424 = arith.divf %422, %423 : vector<8x4xf32>
    %425 = vector.extract_strided_slice %416 {offsets = [0, 4], sizes = [8, 4], strides = [1, 1]} : vector<8x8xf32> to vector<8x4xf32>
    %cst_103 = arith.constant dense<0.000000e+00> : vector<8x4xf32>
    %426 = tpu.matmul %424, %7, %cst_103 {dimension_numbers = #tpu.dot_dimension_numbers<[1], [0], [0], [1], [0, 0, 1, 1], [], []>} : vector<8x4xf32>, vector<4x4xf32>, vector<8x4xf32> -> vector<8x4xf32>
    %427 = arith.addf %425, %426 : vector<8x4xf32>
    %428 = vector.extract_strided_slice %8 {offsets = [4, 0], sizes = [1, 4], strides = [1, 1]} : vector<8x4xf32> to vector<1x4xf32>
    %429 = vector.broadcast %428 : vector<1x4xf32> to vector<8x4xf32>
    %430 = arith.addf %427, %429 : vector<8x4xf32>
    %431 = arith.negf %430 : vector<8x4xf32>
    %432 = math.exp %431 : vector<8x4xf32>
    %cst_104 = arith.constant 1.000000e+00 : f32
    %433 = vector.broadcast %cst_104 : f32 to vector<8x4xf32>
    %434 = arith.addf %433, %432 : vector<8x4xf32>
    %435 = arith.divf %433, %434 : vector<8x4xf32>
    %cst_105 = arith.constant 1.000000e+00 : f32
    %436 = vector.broadcast %cst_105 : f32 to vector<1x1xf32>
    %437 = arith.subf %436, %6 : vector<1x1xf32>
    %438 = vector.broadcast %437 : vector<1x1xf32> to vector<8x4xf32>
    %439 = arith.mulf %438, %435 : vector<8x4xf32>
    %cst_106 = arith.constant 5.000000e-02 : f32
    %440 = vector.broadcast %cst_106 : f32 to vector<1x1xf32>
    %441 = arith.mulf %6, %440 : vector<1x1xf32>
    %442 = vector.broadcast %441 : vector<1x1xf32> to vector<8x4xf32>
    %443 = arith.addf %439, %442 : vector<8x4xf32>
    %444 = vector.extract_strided_slice %2 {offsets = [32, 0], sizes = [8, 4], strides = [1, 1]} : vector<64x4xf32> to vector<8x4xf32>
    %445 = arith.cmpf olt, %444, %443 : vector<8x4xf32>
    %cst_107 = arith.constant 0.000000e+00 : f32
    %446 = vector.broadcast %cst_107 : f32 to vector<8x4xf32>
    %447 = arith.cmpf oeq, %374, %446 : vector<8x4xf32>
    %448 = arith.andi %445, %447 : vector<8x4xi1>
    %449 = arith.select %448, %424, %374 : vector<8x4xi1>, vector<8x4xf32>
    %cst_108 = arith.constant 0.000000e+00 : f32
    %450 = vector.broadcast %cst_108 : f32 to vector<8x4xf32>
    %451 = arith.cmpf oeq, %394, %450 : vector<8x4xf32>
    %452 = arith.andi %445, %451 : vector<8x4xi1>
    %cst_109 = arith.constant 1.000000e+00 : f32
    %453 = vector.broadcast %cst_109 : f32 to vector<8x4xf32>
    %454 = arith.select %452, %453, %394 : vector<8x4xi1>, vector<8x4xf32>
    %cst_110 = arith.constant -1.000000e+00 : f32
    %455 = vector.broadcast %cst_110 : f32 to vector<8x4xf32>
    %456 = arith.cmpf oeq, %375, %455 : vector<8x4xf32>
    %457 = arith.andi %456, %445 : vector<8x4xi1>
    %cst_111 = arith.constant 4.000000e+00 : f32
    %458 = vector.broadcast %cst_111 : f32 to vector<8x4xf32>
    %459 = arith.select %457, %458, %375 : vector<8x4xi1>, vector<8x4xf32>
    %460 = tpu.concatenate %415, %454 in 1 : vector<8x32xf32>, vector<8x4xf32> -> vector<8x36xf32>
    %461 = arith.select %385, %460, %372 : vector<8x36xi1>, vector<8x36xf32>
    %462 = arith.select %389, %413, %373 : vector<8x32xi1>, vector<8x32xf32>
    %463 = arith.select %393, %449, %374 : vector<8x4xi1>, vector<8x4xf32>
    %464 = arith.select %393, %459, %375 : vector<8x4xi1>, vector<8x4xf32>
    %465 = arith.select %393, %424, %376 : vector<8x4xi1>, vector<8x4xf32>
    %466 = vector.shape_cast %464 : vector<8x4xf32> to vector<1x8x4xf32>
    %cst_112 = arith.constant dense<0x7F800000> : vector<1xf32>
    %467 = vector.multi_reduction <minimumf>, %466, %cst_112 [1, 2] : vector<1x8x4xf32> to vector<1xf32>
    %468 = vector.shape_cast %467 : vector<1xf32> to vector<1x1x1xf32>
    %469 = vector.extract %468[0, 0, 0] : f32 from vector<1x1x1xf32>
    %470 = vector.broadcast %469 : f32 to vector<1x1xf32>
    %471 = vector.shape_cast %470 : vector<1x1xf32> to vector<1x1xf32>
    %472 = vector.broadcast %471 : vector<1x1xf32> to vector<8x36xf32>
    %cst_113 = arith.constant 0.000000e+00 : f32
    %473 = vector.broadcast %cst_113 : f32 to vector<8x36xf32>
    %474 = arith.cmpf olt, %472, %473 : vector<8x36xf32>
    %475 = vector.shape_cast %470 : vector<1x1xf32> to vector<1x1xf32>
    %476 = vector.broadcast %475 : vector<1x1xf32> to vector<8x32xf32>
    %cst_114 = arith.constant 0.000000e+00 : f32
    %477 = vector.broadcast %cst_114 : f32 to vector<8x32xf32>
    %478 = arith.cmpf olt, %476, %477 : vector<8x32xf32>
    %479 = vector.shape_cast %470 : vector<1x1xf32> to vector<1x1xf32>
    %480 = vector.broadcast %479 : vector<1x1xf32> to vector<8x4xf32>
    %cst_115 = arith.constant 0.000000e+00 : f32
    %481 = vector.broadcast %cst_115 : f32 to vector<8x4xf32>
    %482 = arith.cmpf olt, %480, %481 : vector<8x4xf32>
    %483 = vector.extract_strided_slice %461 {offsets = [0, 32], sizes = [8, 4], strides = [1, 1]} : vector<8x36xf32> to vector<8x4xf32>
    %484 = vector.extract_strided_slice %13 {offsets = [40, 0], sizes = [8, 128], strides = [1, 1]} : vector<64x128xf32> to vector<8x128xf32>
    %cst_116 = arith.constant dense<0.000000e+00> : vector<8x128xf32>
    %485 = tpu.matmul %461, %0, %cst_116 {dimension_numbers = #tpu.dot_dimension_numbers<[1], [0], [0], [1], [0, 0, 1, 1], [], []>} : vector<8x36xf32>, vector<36x128xf32>, vector<8x128xf32> -> vector<8x128xf32>
    %486 = arith.addf %484, %485 : vector<8x128xf32>
    %487 = arith.negf %486 : vector<8x128xf32>
    %488 = math.exp %487 : vector<8x128xf32>
    %cst_117 = arith.constant 1.000000e+00 : f32
    %489 = vector.broadcast %cst_117 : f32 to vector<8x128xf32>
    %490 = arith.addf %489, %488 : vector<8x128xf32>
    %491 = arith.divf %489, %490 : vector<8x128xf32>
    %492 = vector.extract_strided_slice %491 {offsets = [0, 0], sizes = [8, 32], strides = [1, 1]} : vector<8x128xf32> to vector<8x32xf32>
    %493 = vector.extract_strided_slice %491 {offsets = [0, 32], sizes = [8, 32], strides = [1, 1]} : vector<8x128xf32> to vector<8x32xf32>
    %494 = vector.extract_strided_slice %491 {offsets = [0, 64], sizes = [8, 32], strides = [1, 1]} : vector<8x128xf32> to vector<8x32xf32>
    %cst_118 = arith.constant 2.000000e+00 : f32
    %495 = vector.broadcast %cst_118 : f32 to vector<8x32xf32>
    %496 = arith.mulf %495, %494 : vector<8x32xf32>
    %cst_119 = arith.constant 1.000000e+00 : f32
    %497 = vector.broadcast %cst_119 : f32 to vector<8x32xf32>
    %498 = arith.subf %496, %497 : vector<8x32xf32>
    %499 = vector.extract_strided_slice %491 {offsets = [0, 96], sizes = [8, 32], strides = [1, 1]} : vector<8x128xf32> to vector<8x32xf32>
    %500 = arith.mulf %493, %462 : vector<8x32xf32>
    %501 = arith.mulf %492, %498 : vector<8x32xf32>
    %502 = arith.addf %500, %501 : vector<8x32xf32>
    %503 = math.tanh %502 : vector<8x32xf32>
    %504 = arith.mulf %499, %503 : vector<8x32xf32>
    %cst_120 = arith.constant dense<0.000000e+00> : vector<8x8xf32>
    %505 = tpu.matmul %504, %1, %cst_120 {dimension_numbers = #tpu.dot_dimension_numbers<[1], [0], [0], [1], [0, 0, 1, 1], [], []>} : vector<8x32xf32>, vector<32x8xf32>, vector<8x8xf32> -> vector<8x8xf32>
    %506 = vector.extract_strided_slice %505 {offsets = [0, 0], sizes = [8, 4], strides = [1, 1]} : vector<8x8xf32> to vector<8x4xf32>
    %507 = vector.broadcast %5 : vector<1x4xf32> to vector<8x4xf32>
    %508 = arith.addf %506, %507 : vector<8x4xf32>
    %509 = arith.negf %508 : vector<8x4xf32>
    %510 = math.exp %509 : vector<8x4xf32>
    %cst_121 = arith.constant 1.000000e+00 : f32
    %511 = vector.broadcast %cst_121 : f32 to vector<8x4xf32>
    %512 = arith.addf %511, %510 : vector<8x4xf32>
    %513 = arith.divf %511, %512 : vector<8x4xf32>
    %514 = vector.extract_strided_slice %505 {offsets = [0, 4], sizes = [8, 4], strides = [1, 1]} : vector<8x8xf32> to vector<8x4xf32>
    %cst_122 = arith.constant dense<0.000000e+00> : vector<8x4xf32>
    %515 = tpu.matmul %513, %7, %cst_122 {dimension_numbers = #tpu.dot_dimension_numbers<[1], [0], [0], [1], [0, 0, 1, 1], [], []>} : vector<8x4xf32>, vector<4x4xf32>, vector<8x4xf32> -> vector<8x4xf32>
    %516 = arith.addf %514, %515 : vector<8x4xf32>
    %517 = vector.extract_strided_slice %8 {offsets = [5, 0], sizes = [1, 4], strides = [1, 1]} : vector<8x4xf32> to vector<1x4xf32>
    %518 = vector.broadcast %517 : vector<1x4xf32> to vector<8x4xf32>
    %519 = arith.addf %516, %518 : vector<8x4xf32>
    %520 = arith.negf %519 : vector<8x4xf32>
    %521 = math.exp %520 : vector<8x4xf32>
    %cst_123 = arith.constant 1.000000e+00 : f32
    %522 = vector.broadcast %cst_123 : f32 to vector<8x4xf32>
    %523 = arith.addf %522, %521 : vector<8x4xf32>
    %524 = arith.divf %522, %523 : vector<8x4xf32>
    %cst_124 = arith.constant 1.000000e+00 : f32
    %525 = vector.broadcast %cst_124 : f32 to vector<1x1xf32>
    %526 = arith.subf %525, %6 : vector<1x1xf32>
    %527 = vector.broadcast %526 : vector<1x1xf32> to vector<8x4xf32>
    %528 = arith.mulf %527, %524 : vector<8x4xf32>
    %cst_125 = arith.constant 5.000000e-02 : f32
    %529 = vector.broadcast %cst_125 : f32 to vector<1x1xf32>
    %530 = arith.mulf %6, %529 : vector<1x1xf32>
    %531 = vector.broadcast %530 : vector<1x1xf32> to vector<8x4xf32>
    %532 = arith.addf %528, %531 : vector<8x4xf32>
    %533 = vector.extract_strided_slice %2 {offsets = [40, 0], sizes = [8, 4], strides = [1, 1]} : vector<64x4xf32> to vector<8x4xf32>
    %534 = arith.cmpf olt, %533, %532 : vector<8x4xf32>
    %cst_126 = arith.constant 0.000000e+00 : f32
    %535 = vector.broadcast %cst_126 : f32 to vector<8x4xf32>
    %536 = arith.cmpf oeq, %463, %535 : vector<8x4xf32>
    %537 = arith.andi %534, %536 : vector<8x4xi1>
    %538 = arith.select %537, %513, %463 : vector<8x4xi1>, vector<8x4xf32>
    %cst_127 = arith.constant 0.000000e+00 : f32
    %539 = vector.broadcast %cst_127 : f32 to vector<8x4xf32>
    %540 = arith.cmpf oeq, %483, %539 : vector<8x4xf32>
    %541 = arith.andi %534, %540 : vector<8x4xi1>
    %cst_128 = arith.constant 1.000000e+00 : f32
    %542 = vector.broadcast %cst_128 : f32 to vector<8x4xf32>
    %543 = arith.select %541, %542, %483 : vector<8x4xi1>, vector<8x4xf32>
    %cst_129 = arith.constant -1.000000e+00 : f32
    %544 = vector.broadcast %cst_129 : f32 to vector<8x4xf32>
    %545 = arith.cmpf oeq, %464, %544 : vector<8x4xf32>
    %546 = arith.andi %545, %534 : vector<8x4xi1>
    %cst_130 = arith.constant 5.000000e+00 : f32
    %547 = vector.broadcast %cst_130 : f32 to vector<8x4xf32>
    %548 = arith.select %546, %547, %464 : vector<8x4xi1>, vector<8x4xf32>
    %549 = tpu.concatenate %504, %543 in 1 : vector<8x32xf32>, vector<8x4xf32> -> vector<8x36xf32>
    %550 = arith.select %474, %549, %461 : vector<8x36xi1>, vector<8x36xf32>
    %551 = arith.select %478, %502, %462 : vector<8x32xi1>, vector<8x32xf32>
    %552 = arith.select %482, %538, %463 : vector<8x4xi1>, vector<8x4xf32>
    %553 = arith.select %482, %548, %464 : vector<8x4xi1>, vector<8x4xf32>
    %554 = arith.select %482, %513, %465 : vector<8x4xi1>, vector<8x4xf32>
    %555 = vector.shape_cast %553 : vector<8x4xf32> to vector<1x8x4xf32>
    %cst_131 = arith.constant dense<0x7F800000> : vector<1xf32>
    %556 = vector.multi_reduction <minimumf>, %555, %cst_131 [1, 2] : vector<1x8x4xf32> to vector<1xf32>
    %557 = vector.shape_cast %556 : vector<1xf32> to vector<1x1x1xf32>
    %558 = vector.extract %557[0, 0, 0] : f32 from vector<1x1x1xf32>
    %559 = vector.broadcast %558 : f32 to vector<1x1xf32>
    %560 = vector.shape_cast %559 : vector<1x1xf32> to vector<1x1xf32>
    %561 = vector.broadcast %560 : vector<1x1xf32> to vector<8x36xf32>
    %cst_132 = arith.constant 0.000000e+00 : f32
    %562 = vector.broadcast %cst_132 : f32 to vector<8x36xf32>
    %563 = arith.cmpf olt, %561, %562 : vector<8x36xf32>
    %564 = vector.shape_cast %559 : vector<1x1xf32> to vector<1x1xf32>
    %565 = vector.broadcast %564 : vector<1x1xf32> to vector<8x32xf32>
    %cst_133 = arith.constant 0.000000e+00 : f32
    %566 = vector.broadcast %cst_133 : f32 to vector<8x32xf32>
    %567 = arith.cmpf olt, %565, %566 : vector<8x32xf32>
    %568 = vector.shape_cast %559 : vector<1x1xf32> to vector<1x1xf32>
    %569 = vector.broadcast %568 : vector<1x1xf32> to vector<8x4xf32>
    %cst_134 = arith.constant 0.000000e+00 : f32
    %570 = vector.broadcast %cst_134 : f32 to vector<8x4xf32>
    %571 = arith.cmpf olt, %569, %570 : vector<8x4xf32>
    %572 = vector.extract_strided_slice %550 {offsets = [0, 32], sizes = [8, 4], strides = [1, 1]} : vector<8x36xf32> to vector<8x4xf32>
    %573 = vector.extract_strided_slice %13 {offsets = [48, 0], sizes = [8, 128], strides = [1, 1]} : vector<64x128xf32> to vector<8x128xf32>
    %cst_135 = arith.constant dense<0.000000e+00> : vector<8x128xf32>
    %574 = tpu.matmul %550, %0, %cst_135 {dimension_numbers = #tpu.dot_dimension_numbers<[1], [0], [0], [1], [0, 0, 1, 1], [], []>} : vector<8x36xf32>, vector<36x128xf32>, vector<8x128xf32> -> vector<8x128xf32>
    %575 = arith.addf %573, %574 : vector<8x128xf32>
    %576 = arith.negf %575 : vector<8x128xf32>
    %577 = math.exp %576 : vector<8x128xf32>
    %cst_136 = arith.constant 1.000000e+00 : f32
    %578 = vector.broadcast %cst_136 : f32 to vector<8x128xf32>
    %579 = arith.addf %578, %577 : vector<8x128xf32>
    %580 = arith.divf %578, %579 : vector<8x128xf32>
    %581 = vector.extract_strided_slice %580 {offsets = [0, 0], sizes = [8, 32], strides = [1, 1]} : vector<8x128xf32> to vector<8x32xf32>
    %582 = vector.extract_strided_slice %580 {offsets = [0, 32], sizes = [8, 32], strides = [1, 1]} : vector<8x128xf32> to vector<8x32xf32>
    %583 = vector.extract_strided_slice %580 {offsets = [0, 64], sizes = [8, 32], strides = [1, 1]} : vector<8x128xf32> to vector<8x32xf32>
    %cst_137 = arith.constant 2.000000e+00 : f32
    %584 = vector.broadcast %cst_137 : f32 to vector<8x32xf32>
    %585 = arith.mulf %584, %583 : vector<8x32xf32>
    %cst_138 = arith.constant 1.000000e+00 : f32
    %586 = vector.broadcast %cst_138 : f32 to vector<8x32xf32>
    %587 = arith.subf %585, %586 : vector<8x32xf32>
    %588 = vector.extract_strided_slice %580 {offsets = [0, 96], sizes = [8, 32], strides = [1, 1]} : vector<8x128xf32> to vector<8x32xf32>
    %589 = arith.mulf %582, %551 : vector<8x32xf32>
    %590 = arith.mulf %581, %587 : vector<8x32xf32>
    %591 = arith.addf %589, %590 : vector<8x32xf32>
    %592 = math.tanh %591 : vector<8x32xf32>
    %593 = arith.mulf %588, %592 : vector<8x32xf32>
    %cst_139 = arith.constant dense<0.000000e+00> : vector<8x8xf32>
    %594 = tpu.matmul %593, %1, %cst_139 {dimension_numbers = #tpu.dot_dimension_numbers<[1], [0], [0], [1], [0, 0, 1, 1], [], []>} : vector<8x32xf32>, vector<32x8xf32>, vector<8x8xf32> -> vector<8x8xf32>
    %595 = vector.extract_strided_slice %594 {offsets = [0, 0], sizes = [8, 4], strides = [1, 1]} : vector<8x8xf32> to vector<8x4xf32>
    %596 = vector.broadcast %5 : vector<1x4xf32> to vector<8x4xf32>
    %597 = arith.addf %595, %596 : vector<8x4xf32>
    %598 = arith.negf %597 : vector<8x4xf32>
    %599 = math.exp %598 : vector<8x4xf32>
    %cst_140 = arith.constant 1.000000e+00 : f32
    %600 = vector.broadcast %cst_140 : f32 to vector<8x4xf32>
    %601 = arith.addf %600, %599 : vector<8x4xf32>
    %602 = arith.divf %600, %601 : vector<8x4xf32>
    %603 = vector.extract_strided_slice %594 {offsets = [0, 4], sizes = [8, 4], strides = [1, 1]} : vector<8x8xf32> to vector<8x4xf32>
    %cst_141 = arith.constant dense<0.000000e+00> : vector<8x4xf32>
    %604 = tpu.matmul %602, %7, %cst_141 {dimension_numbers = #tpu.dot_dimension_numbers<[1], [0], [0], [1], [0, 0, 1, 1], [], []>} : vector<8x4xf32>, vector<4x4xf32>, vector<8x4xf32> -> vector<8x4xf32>
    %605 = arith.addf %603, %604 : vector<8x4xf32>
    %606 = vector.extract_strided_slice %8 {offsets = [6, 0], sizes = [1, 4], strides = [1, 1]} : vector<8x4xf32> to vector<1x4xf32>
    %607 = vector.broadcast %606 : vector<1x4xf32> to vector<8x4xf32>
    %608 = arith.addf %605, %607 : vector<8x4xf32>
    %609 = arith.negf %608 : vector<8x4xf32>
    %610 = math.exp %609 : vector<8x4xf32>
    %cst_142 = arith.constant 1.000000e+00 : f32
    %611 = vector.broadcast %cst_142 : f32 to vector<8x4xf32>
    %612 = arith.addf %611, %610 : vector<8x4xf32>
    %613 = arith.divf %611, %612 : vector<8x4xf32>
    %cst_143 = arith.constant 1.000000e+00 : f32
    %614 = vector.broadcast %cst_143 : f32 to vector<1x1xf32>
    %615 = arith.subf %614, %6 : vector<1x1xf32>
    %616 = vector.broadcast %615 : vector<1x1xf32> to vector<8x4xf32>
    %617 = arith.mulf %616, %613 : vector<8x4xf32>
    %cst_144 = arith.constant 5.000000e-02 : f32
    %618 = vector.broadcast %cst_144 : f32 to vector<1x1xf32>
    %619 = arith.mulf %6, %618 : vector<1x1xf32>
    %620 = vector.broadcast %619 : vector<1x1xf32> to vector<8x4xf32>
    %621 = arith.addf %617, %620 : vector<8x4xf32>
    %622 = vector.extract_strided_slice %2 {offsets = [48, 0], sizes = [8, 4], strides = [1, 1]} : vector<64x4xf32> to vector<8x4xf32>
    %623 = arith.cmpf olt, %622, %621 : vector<8x4xf32>
    %cst_145 = arith.constant 0.000000e+00 : f32
    %624 = vector.broadcast %cst_145 : f32 to vector<8x4xf32>
    %625 = arith.cmpf oeq, %552, %624 : vector<8x4xf32>
    %626 = arith.andi %623, %625 : vector<8x4xi1>
    %627 = arith.select %626, %602, %552 : vector<8x4xi1>, vector<8x4xf32>
    %cst_146 = arith.constant 0.000000e+00 : f32
    %628 = vector.broadcast %cst_146 : f32 to vector<8x4xf32>
    %629 = arith.cmpf oeq, %572, %628 : vector<8x4xf32>
    %630 = arith.andi %623, %629 : vector<8x4xi1>
    %cst_147 = arith.constant 1.000000e+00 : f32
    %631 = vector.broadcast %cst_147 : f32 to vector<8x4xf32>
    %632 = arith.select %630, %631, %572 : vector<8x4xi1>, vector<8x4xf32>
    %cst_148 = arith.constant -1.000000e+00 : f32
    %633 = vector.broadcast %cst_148 : f32 to vector<8x4xf32>
    %634 = arith.cmpf oeq, %553, %633 : vector<8x4xf32>
    %635 = arith.andi %634, %623 : vector<8x4xi1>
    %cst_149 = arith.constant 6.000000e+00 : f32
    %636 = vector.broadcast %cst_149 : f32 to vector<8x4xf32>
    %637 = arith.select %635, %636, %553 : vector<8x4xi1>, vector<8x4xf32>
    %638 = tpu.concatenate %593, %632 in 1 : vector<8x32xf32>, vector<8x4xf32> -> vector<8x36xf32>
    %639 = arith.select %563, %638, %550 : vector<8x36xi1>, vector<8x36xf32>
    %640 = arith.select %567, %591, %551 : vector<8x32xi1>, vector<8x32xf32>
    %641 = arith.select %571, %627, %552 : vector<8x4xi1>, vector<8x4xf32>
    %642 = arith.select %571, %637, %553 : vector<8x4xi1>, vector<8x4xf32>
    %643 = arith.select %571, %602, %554 : vector<8x4xi1>, vector<8x4xf32>
    %644 = vector.shape_cast %642 : vector<8x4xf32> to vector<1x8x4xf32>
    %cst_150 = arith.constant dense<0x7F800000> : vector<1xf32>
    %645 = vector.multi_reduction <minimumf>, %644, %cst_150 [1, 2] : vector<1x8x4xf32> to vector<1xf32>
    %646 = vector.shape_cast %645 : vector<1xf32> to vector<1x1x1xf32>
    %647 = vector.extract %646[0, 0, 0] : f32 from vector<1x1x1xf32>
    %648 = vector.broadcast %647 : f32 to vector<1x1xf32>
    %649 = vector.shape_cast %648 : vector<1x1xf32> to vector<1x1xf32>
    %650 = vector.broadcast %649 : vector<1x1xf32> to vector<8x4xf32>
    %cst_151 = arith.constant 0.000000e+00 : f32
    %651 = vector.broadcast %cst_151 : f32 to vector<8x4xf32>
    %652 = arith.cmpf olt, %650, %651 : vector<8x4xf32>
    %653 = vector.extract_strided_slice %13 {offsets = [56, 0], sizes = [8, 128], strides = [1, 1]} : vector<64x128xf32> to vector<8x128xf32>
    %cst_152 = arith.constant dense<0.000000e+00> : vector<8x128xf32>
    %654 = tpu.matmul %639, %0, %cst_152 {dimension_numbers = #tpu.dot_dimension_numbers<[1], [0], [0], [1], [0, 0, 1, 1], [], []>} : vector<8x36xf32>, vector<36x128xf32>, vector<8x128xf32> -> vector<8x128xf32>
    %655 = arith.addf %653, %654 : vector<8x128xf32>
    %656 = arith.negf %655 : vector<8x128xf32>
    %657 = math.exp %656 : vector<8x128xf32>
    %cst_153 = arith.constant 1.000000e+00 : f32
    %658 = vector.broadcast %cst_153 : f32 to vector<8x128xf32>
    %659 = arith.addf %658, %657 : vector<8x128xf32>
    %660 = arith.divf %658, %659 : vector<8x128xf32>
    %661 = vector.extract_strided_slice %660 {offsets = [0, 0], sizes = [8, 32], strides = [1, 1]} : vector<8x128xf32> to vector<8x32xf32>
    %662 = vector.extract_strided_slice %660 {offsets = [0, 32], sizes = [8, 32], strides = [1, 1]} : vector<8x128xf32> to vector<8x32xf32>
    %663 = vector.extract_strided_slice %660 {offsets = [0, 64], sizes = [8, 32], strides = [1, 1]} : vector<8x128xf32> to vector<8x32xf32>
    %cst_154 = arith.constant 2.000000e+00 : f32
    %664 = vector.broadcast %cst_154 : f32 to vector<8x32xf32>
    %665 = arith.mulf %664, %663 : vector<8x32xf32>
    %cst_155 = arith.constant 1.000000e+00 : f32
    %666 = vector.broadcast %cst_155 : f32 to vector<8x32xf32>
    %667 = arith.subf %665, %666 : vector<8x32xf32>
    %668 = vector.extract_strided_slice %660 {offsets = [0, 96], sizes = [8, 32], strides = [1, 1]} : vector<8x128xf32> to vector<8x32xf32>
    %669 = arith.mulf %662, %640 : vector<8x32xf32>
    %670 = arith.mulf %661, %667 : vector<8x32xf32>
    %671 = arith.addf %669, %670 : vector<8x32xf32>
    %672 = math.tanh %671 : vector<8x32xf32>
    %673 = arith.mulf %668, %672 : vector<8x32xf32>
    %cst_156 = arith.constant dense<0.000000e+00> : vector<8x8xf32>
    %674 = tpu.matmul %673, %1, %cst_156 {dimension_numbers = #tpu.dot_dimension_numbers<[1], [0], [0], [1], [0, 0, 1, 1], [], []>} : vector<8x32xf32>, vector<32x8xf32>, vector<8x8xf32> -> vector<8x8xf32>
    %675 = vector.extract_strided_slice %674 {offsets = [0, 0], sizes = [8, 4], strides = [1, 1]} : vector<8x8xf32> to vector<8x4xf32>
    %676 = vector.broadcast %5 : vector<1x4xf32> to vector<8x4xf32>
    %677 = arith.addf %675, %676 : vector<8x4xf32>
    %678 = arith.negf %677 : vector<8x4xf32>
    %679 = math.exp %678 : vector<8x4xf32>
    %cst_157 = arith.constant 1.000000e+00 : f32
    %680 = vector.broadcast %cst_157 : f32 to vector<8x4xf32>
    %681 = arith.addf %680, %679 : vector<8x4xf32>
    %682 = arith.divf %680, %681 : vector<8x4xf32>
    %683 = vector.extract_strided_slice %674 {offsets = [0, 4], sizes = [8, 4], strides = [1, 1]} : vector<8x8xf32> to vector<8x4xf32>
    %cst_158 = arith.constant dense<0.000000e+00> : vector<8x4xf32>
    %684 = tpu.matmul %682, %7, %cst_158 {dimension_numbers = #tpu.dot_dimension_numbers<[1], [0], [0], [1], [0, 0, 1, 1], [], []>} : vector<8x4xf32>, vector<4x4xf32>, vector<8x4xf32> -> vector<8x4xf32>
    %685 = arith.addf %683, %684 : vector<8x4xf32>
    %686 = vector.extract_strided_slice %8 {offsets = [7, 0], sizes = [1, 4], strides = [1, 1]} : vector<8x4xf32> to vector<1x4xf32>
    %687 = vector.broadcast %686 : vector<1x4xf32> to vector<8x4xf32>
    %688 = arith.addf %685, %687 : vector<8x4xf32>
    %689 = arith.negf %688 : vector<8x4xf32>
    %690 = math.exp %689 : vector<8x4xf32>
    %cst_159 = arith.constant 1.000000e+00 : f32
    %691 = vector.broadcast %cst_159 : f32 to vector<8x4xf32>
    %692 = arith.addf %691, %690 : vector<8x4xf32>
    %693 = arith.divf %691, %692 : vector<8x4xf32>
    %cst_160 = arith.constant 1.000000e+00 : f32
    %694 = vector.broadcast %cst_160 : f32 to vector<1x1xf32>
    %695 = arith.subf %694, %6 : vector<1x1xf32>
    %696 = vector.broadcast %695 : vector<1x1xf32> to vector<8x4xf32>
    %697 = arith.mulf %696, %693 : vector<8x4xf32>
    %cst_161 = arith.constant 5.000000e-02 : f32
    %698 = vector.broadcast %cst_161 : f32 to vector<1x1xf32>
    %699 = arith.mulf %6, %698 : vector<1x1xf32>
    %700 = vector.broadcast %699 : vector<1x1xf32> to vector<8x4xf32>
    %701 = arith.addf %697, %700 : vector<8x4xf32>
    %702 = vector.extract_strided_slice %2 {offsets = [56, 0], sizes = [8, 4], strides = [1, 1]} : vector<64x4xf32> to vector<8x4xf32>
    %703 = arith.cmpf olt, %702, %701 : vector<8x4xf32>
    %cst_162 = arith.constant 0.000000e+00 : f32
    %704 = vector.broadcast %cst_162 : f32 to vector<8x4xf32>
    %705 = arith.cmpf oeq, %641, %704 : vector<8x4xf32>
    %706 = arith.andi %703, %705 : vector<8x4xi1>
    %707 = arith.select %706, %682, %641 : vector<8x4xi1>, vector<8x4xf32>
    %cst_163 = arith.constant -1.000000e+00 : f32
    %708 = vector.broadcast %cst_163 : f32 to vector<8x4xf32>
    %709 = arith.cmpf oeq, %642, %708 : vector<8x4xf32>
    %710 = arith.andi %709, %703 : vector<8x4xi1>
    %cst_164 = arith.constant 7.000000e+00 : f32
    %711 = vector.broadcast %cst_164 : f32 to vector<8x4xf32>
    %712 = arith.select %710, %711, %642 : vector<8x4xi1>, vector<8x4xf32>
    %713 = arith.select %652, %707, %641 : vector<8x4xi1>, vector<8x4xf32>
    %714 = arith.select %652, %712, %642 : vector<8x4xi1>, vector<8x4xf32>
    %715 = arith.select %652, %682, %643 : vector<8x4xi1>, vector<8x4xf32>
    %cst_165 = arith.constant 0.000000e+00 : f32
    %716 = vector.broadcast %cst_165 : f32 to vector<8x4xf32>
    %717 = arith.cmpf oeq, %713, %716 : vector<8x4xf32>
    %718 = arith.select %717, %715, %713 : vector<8x4xi1>, vector<8x4xf32>
    %cst_166 = arith.constant -1.000000e+00 : f32
    %719 = vector.broadcast %cst_166 : f32 to vector<8x4xf32>
    %720 = arith.cmpf oeq, %714, %719 : vector<8x4xf32>
    %cst_167 = arith.constant 7.000000e+00 : f32
    %721 = vector.broadcast %cst_167 : f32 to vector<8x4xf32>
    %722 = arith.select %720, %721, %714 : vector<8x4xi1>, vector<8x4xf32>
    %c0_168 = arith.constant 0 : index
    %c0_169 = arith.constant 0 : index
    %723 = vector.load %arg6[%c0_168, %c0_169] : memref<8x4xf32, #tpu.memory_space<vmem>>, vector<8x4xf32>
    tpu.vector_store %arg6[%c0_168, %c0_169], %718 {strides = array<i32>} : memref<8x4xf32, #tpu.memory_space<vmem>>, vector<8x4xf32>,
    %cst_170 = arith.constant 1.000000e+00 : f32
    %724 = vector.broadcast %cst_170 : f32 to vector<8x4xf32>
    %725 = arith.addf %724, %722 : vector<8x4xf32>
    %726 = vector.shape_cast %725 : vector<8x4xf32> to vector<1x8x4xf32>
    %cst_171 = arith.constant dense<0.000000e+00> : vector<1xf32>
    %727 = vector.multi_reduction <add>, %726, %cst_171 [1, 2] : vector<1x8x4xf32> to vector<1xf32>
    %728 = vector.shape_cast %727 : vector<1xf32> to vector<1x1x1xf32>
    %729 = vector.extract %728[0, 0, 0] : f32 from vector<1x1x1xf32>
    %cst_172 = arith.constant 3.200000e+01 : f32
    %730 = arith.divf %729, %cst_172 : f32
    %cst_173 = arith.constant 9.000000e+00 : f32
    %731 = arith.divf %730, %cst_173 : f32
    %c0_174 = arith.constant 0 : index
    %c0_175 = arith.constant 0 : index
    %732 = memref.load %arg7[%c0_174, %c0_175] : memref<1x1xf32, #tpu.memory_space<smem>>
    memref.store %731, %arg7[%c0_174, %c0_175] : memref<1x1xf32, #tpu.memory_space<smem>>
    return
  }
}

</mosaic_0001>

<bundles_post_ra>
// kernel: tpu_custom_call.1
= control target key start
LH: loop header
LB: loop body
LE: loop exit
PB: predicated region body
PF: predicated region fallthrough
CT: control target
= control target key end

     0   :  { %vm59_vm0 = vcmask 130048   ;;  %v3482_v3 = vmov 0.0|0.0   ;;  %vm3483_vm1 = vmmov 0   ;;  %v3484_v10 = vmov 0.0   ;;  %s4409_s0 = inlined_call_operand.vmem [shape: f32[64,16], index: 0, kind: input, shape index: {}]   ;;  %s4410_s1 = inlined_call_operand.vmem [shape: f32[64,4], index: 1, kind: input, shape index: {}]   ;;  %s4411_s2 = inlined_call_operand.vmem [shape: f32[16,128], index: 2, kind: input, shape index: {}]   ;;  %s4412_s3 = inlined_call_operand.vmem [shape: f32[36,128], index: 3, kind: input, shape index: {}]   ;;  %s4413_s4 = inlined_call_operand.vmem [shape: f32[32,8], index: 4, kind: input, shape index: {}]   ;;  %s4414_s5 = inlined_call_operand.vmem [shape: f32[14,128], index: 5, kind: input, shape index: {}]   ;;  %s4415_s6 = inlined_call_operand.vmem [shape: f32[8,4], index: 6, kind: output, shape index: {0}]   ;;  %s4416_s7 = inlined_call_operand.hbm [shape: f32[1,1], index: 7, kind: output, shape index: {1}]  }
   0x1   :  { %v26_v0 = vld [vmem:[%s4412_s3] sm:$0xff]  ;;  %v27_v1 = vld [vmem:[%s4412_s3 + $0x8] sm:$0xff]  ;;  %3229 = vmatprep.subr.bf16.mxu1 %v3482_v3  ;;  %v28_v7 = vld [vmem:[%s4412_s3 + $0x10] sm:$0xff]  ;;  %3003 = vmatprep.mubr.msk.f32.mxu1 %vm3483_vm1, %v3484_v10 }
   0x2   :  { %v53_v2 = vld [vmem:[%s4411_s2] sm:$0xff]  ;;  %v3543_v4 = vpack.c.bf16 %v27_v1, %v26_v0  ;;  %v54_v5 = vld [vmem:[%s4411_s2 + $0x8] sm:$0xff]  ;;  %v29_v9 = vld [vmem:[%s4412_s3 + $0x18] sm:$0xff] }
   0x3   :  { %v45_v6 = vld [vmem:[%s4409_s0] sm:$0xff]  ;;  %v3225_v8 = vpack.c.bf16 %v54_v5, %v53_v2  ;;  %v3561_v11 = vpack.c.bf16 %v29_v9, %v28_v7 }
   0x4   :  { %2981 = vmatprep.mubr.msk.f32.mxu0 %vm59_vm0, %v45_v6  ;;  %3231 = vmatpush3.bf16.msra.mxu1 %v3543_v4 }
   0x5   :  { %13 = vsyncpa [#allocation3], 0  ;;  %3226 = vmatprep.subr.bf16.mxu0 %v3225_v8  ;;  %3232 = vmatprep.subr.bf16.mxu1 %v3482_v3  ;;  %v46_v12 = vld [vmem:[%s4409_s0 + $0x8] sm:$0xff]  ;;  %v3574_v13 = vld [vmem:[%s4412_s3 + $0x20] sm:$0xf]  ;;  %vm195_vm2 = vcmask 1043456   ;;  %v55_v14 = vlaneseq }
   0x6   :  { %3228 = vmatpush3.bf16.msra.mxu0 %v3225_v8  ;;  %v3588_v17 = vld [vmem:[%s4414_s5] sm:$0xff]  ;;  %s3485_s20 = smov 64   ;;  %s3486_s21 = smov 32   ;;  %v32_v37 = vld [vmem:[%s4413_s4 + $0x8] sm:$0xff]  ;;  %v33_v38 = vld [vmem:[%s4413_s4 + $0x10] sm:$0xff]  ;;  %vm298_vm3 = vcmask 261120  }
   0x7   :  { %3017 = vmatprep.subr.mxu0 %v3484_v10  ;;  %v3582_v15 = vshrl.u32 %v55_v14, 7  ;;  %v31_v36 = vld [vmem:[%s4413_s4] sm:$0xff]  ;;  %v34_v40 = vld [vmem:[%s4413_s4 + $0x18] sm:$0xff]  ;;  %v47_v46 = vld [vmem:[%s4409_s0 + $0x10] sm:$0xff]  ;;  %v3647_v48 = vrot.slane %v3588_v17, 2  ;;  %v480_v53 = vsub.f32 1.0, %v3588_v17 }
   0x8   :  { %3234 = vmatpush3.bf16.msra.mxu1 %v3561_v11  ;;  %v3612_v39 = vpack.c.bf16 %v32_v37, %v31_v36  ;;  %v3618_v41 = vpack.c.bf16 %v34_v40, %v33_v38  ;;  %v48_v47 = vld [vmem:[%s4409_s0 + $0x18] sm:$0xff]  ;;  %v49_v49 = vld [vmem:[%s4409_s0 + $0x20] sm:$0xff]  ;;  %v50_v50 = vld [vmem:[%s4409_s0 + $0x28] sm:$0xff]  ;;  %v489_v54 = vmul.f32 0.05, %v3588_v17  ;;  %s3487_s17 = smov 124  }
   0x9   :  { %2982 = vmatmul.mubr.msk.f32.vlgmr.msra.gmra.mrb[0].mxu0 %vm59_vm0, %v46_v12  ;;  %3001 = vmatprep.subr.mxu1 %v3484_v10  ;;  %v57_v16 = vsub.s32 0, %v3582_v15  ;;  %v51_v51 = vld [vmem:[%s4409_s0 + $0x30] sm:$0xff]  ;;  %v52_v52 = vld [vmem:[%s4409_s0 + $0x38] sm:$0xff]  ;;  %v482_v55 = vrot.slane %v480_v53, 1  ;;  %v373_v57 = vsub.s32 1, %v3582_v15  ;;  %vm384_vm4 = vcmask 31744  }
   0xa   :  { %2984 = vmatprep.mubr.msk.f32.mxu0 %vm59_vm0, %v47_v46  ;;  %3018 = vmatpush3.msk.msra.mxu0 %vm195_vm2, %v3647_v48  ;;  %v491_v56 = vrot.slane %v489_v54, 1  ;;  %v467_v12 = vsub.s32 6, %v3582_v15  ;;  %s3488_s0 = smov 4   ;;  %v3717_v37 = vld [vmem:[%s4410_s1] sm:$0xff]  ;;  %vm191_vm6 = vcmask 293888   ;;  %s3490_s24 = smov 96  }
   0xb   :  { %v3593_v18 = vrot.slane %v3588_v17, %v57_v16  ;;  %3247 = vmatprep.subr.bf16.mxu0 %v3482_v3  ;;  %v3678_v58 = vrot.slane %v3588_v17, %v373_v57 }
   0xc   :  { %3002 = vmatpush3.msk.msra.mxu1 %vm195_vm2, %v3574_v13  ;;  %v468_v14 = vrot.slane %v3588_v17, %v467_v12 }
   0xd   :  { %3004 = vmatmul.mubr.f32.vlgmr.msra.gmra.mrb[0].mxu1 %v3484_v10  ;;  %3235 = vmatprep.subr.bf16.mxu1 %v3482_v3 }
   0xe   :  { %3014 = vmatprep.mubr.msk.f32.mxu1 %vm3483_vm1, %v3484_v10  ;;  %3237 = vmatpush3.bf16.msra.mxu1 %v3612_v39 }
   0xf   :  { %3238 = vmatprep.subr.bf16.mxu1 %v3482_v3  ;;  %2985 = vmatmul.mubr.msk.f32.gmra.mrb[2].mxu0 %vm59_vm0, %v48_v47 }
  0x10   :  { %2987 = vmatprep.mubr.msk.f32.mxu0 %vm59_vm0, %v49_v49 }
  0x12   :  { %3240 = vmatpush3.bf16.msra.mxu1 %v3618_v41 }
  0x13   :  { %3241 = vmatprep.subr.bf16.mxu1 %v3482_v3  ;;  %2988 = vmatmul.mubr.msk.f32.gmra.mrb[4].mxu0 %vm59_vm0, %v50_v50 }
  0x14   :  { %2990 = vmatprep.mubr.msk.f32.mxu0 %vm59_vm0, %v51_v51 }
  0x17   :  { %2991 = vmatmul.mubr.msk.f32.gmra.mrb[6].mxu0 %vm59_vm0, %v52_v52 }
  0x18   :  { %3019 = vmatprep.mubr.msk.f32.mxu0 %vm3483_vm1, %v3484_v10 }
  0xdc   :  { %v3595_v19 = vpop.f32.mrb[0].mxu0 }
  0xdd   :  { %v150_v20 = vpop.f32.mrb[1].mxu0 }
  0xde   :  { %v151_v21 = vadd.f32 %v150_v20, %v3593_v18 }
  0xe0   :  { %v265_v22 = vpop.f32.mrb[0].mxu1 }
  0xe1   :  { %v269_v23 = vadd.f32 %v265_v22, %v151_v21  ;;  %v3005_v24 = vpop.f32.mrb[1].mxu1 }
  0xe2   :  { %v3691_v2 = vpop.f32.mrb[2].mxu0 }
  0xe3   :  { %v2793_v25 = vmul.f32 -1.442695, %v269_v23  ;;  %v3693_v5 = vpop.f32.mrb[3].mxu0 }
  0xe5   :  { %3356 = vpow2.f32 %v2793_v25 }
  0xe6   :  { %v3695_v6 = vpop.f32.mrb[4].mxu0 }
  0xe7   :  { %v3697_v7 = vpop.f32.mrb[5].mxu0 }
  0xea   :  { %v3699_v8 = vpop.f32.mrb[6].mxu0 }
  0xeb   :  { %v3701_v9 = vpop.f32.mrb[7].mxu0 }
  0xef   :  { %v3357_v26 = vpop.eup %3356 }
  0xf0   :  { %v273_v27 = vadd.f32 1.0, %v3357_v26 }
  0xf2   :  { %3358 = vrcp.f32 %v273_v27 }
  0xfc   :  { %v3359_v28 = vpop.eup %3358 }
  0xfd   :  { %v276_v29 = vmul.f32 2.0, %v3359_v28  ;;  %v278_v33 = vmul.f32 0.0, %v3359_v28 }
  0xff   :  { %v2794_v30 = vadd.f32 -1.0, %v276_v29 }
 0x101   :  { %280 = vrot.lane.b32.xlu0 %v2794_v30, %s3485_s20 }
 0x173   :  { %v281_v31 = vpop.permute.xlu0 %280 }
 0x174   :  { %v283_v32 = vmul.f32 %v3359_v28, %v281_v31 }
 0x176   :  { %285 = vrot.lane.b32.xlu0 %v283_v32, %s3486_s21 }
 0x17a   :  { %483 = vrot.lane.b32.xlu0 %v482_v55, %s3487_s17 }
 0x1e8   :  { %v286_v34 = vpop.permute.xlu0 %285 }
 0x1e9   :  { %v3600_v35 = vadd.f32 %v286_v34, %v278_v33 }
 0x1eb   :  { %3360 = vtanh.f32 %v3600_v35 }
 0x1ec   :  { %v484_v20 = vpop.permute.xlu0 %483 }
 0x1ed   :  { %3325 = vpush %v484_v20 }
 0x1f5   :  { %v3361_v42 = vpop.eup %3360 }
 0x1f6   :  { %291 = vrot.lane.b32.xlu1 %v3361_v42, %s3485_s20 }
 0x21e   :  { %s3326_s18 = spop %3325 }
 0x21f   :  { %v3707_v31 = vstv %s3326_s18 }
 0x268   :  { %v292_v43 = vpop.permute.xlu1 %291 }
 0x269   :  { %v294_v44 = vmul.f32 %v3359_v28, %v292_v43 }
 0x26b   :  { %296 = vrot.lane.b32.xlu1 %v294_v44, %s3486_s21  ;;  %v156_v44 = vadd.f32 %v3595_v19, %v3593_v18 }
 0x26f   :  { %492 = vrot.lane.b32.xlu1 %v491_v56, %s3487_s17 }
 0x273   :  { %470 = vrot.lane.b32.xlu1 %v468_v14, %s3488_s0  ;;  %v3489_v14 = vmov 0  }
 0x2dd   :  { %v3625_v45 = vpop.permute.xlu1 %296 }
 0x2de   :  { %3015 = vmatmul.mubr.msk.f32.vlgmr.msra.gmra.mrb[2].mxu1 %vm298_vm3, %v3625_v45 }
 0x2df   :  { %3243 = vmatpush3.bf16.msra.mxu1 %v3543_v4  ;;  %3032 = vmatprep.mubr.msk.f32.mxu1 %vm3483_vm1, %v3484_v10 }
 0x2e0   :  { %3244 = vmatprep.subr.bf16.mxu1 %v3482_v3 }
 0x2e1   :  { %v493_v21 = vpop.permute.xlu1 %492 }
 0x2e2   :  { %3327 = vpush %v493_v21 }
 0x2e3   :  { %3246 = vmatpush3.bf16.msra.mxu1 %v3561_v11 }
 0x2e4   :  { %3030 = vmatprep.subr.mxu1 %v3484_v10 }
 0x2e5   :  { %v471_v25 = vpop.permute.xlu1 %470 }
 0x2e7   :  { %3031 = vmatpush3.msk.msra.mxu1 %vm195_vm2, %v3574_v13 }
 0x2e8   :  { %3253 = vmatprep.subr.bf16.mxu1 %v3482_v3 }
 0x313   :  { %s3328_s19 = spop %3327 }
 0x314   :  { %v3709_v33 = vstv %s3328_s19 }
 0x3b1   :  { %v367_v59 = vpop.f32.mrb[2].mxu1 }
 0x3b2   :  { %v375_v60 = vadd.f32 %v3678_v58, %v367_v59  ;;  %v3016_v61 = vpop.f32.mrb[3].mxu1 }
 0x3b4   :  { %v2796_v62 = vmul.f32 -1.442695, %v375_v60 }
 0x3b6   :  { %3362 = vpow2.f32 %v2796_v62  ;;  %v794_v62 = vsub.s32 7, %v3582_v15 }
 0x3b8   :  { %v795_v12 = vrot.slane %v3588_v17, %v794_v62 }
 0x3c0   :  { %v3363_v63 = vpop.eup %3362 }
 0x3c1   :  { %v379_v0 = vadd.f32 1.0, %v3363_v63 }
 0x3c3   :  { %3364 = vrcp.f32 %v379_v0 }
 0x3cd   :  { %v3681_v1 = vpop.eup %3364 }
 0x3ce   :  { %3020 = vmatmul.mubr.msk.f32.vlgmr.msra.gmra.mrb[8].mxu0 %vm384_vm4, %v3681_v1 }
 0x3cf   :  { %3249 = vmatpush3.bf16.msra.mxu0 %v3612_v39  ;;  %3043 = vmatprep.mubr.msk.f32.mxu0 %vm3483_vm1, %v3484_v10 }
 0x3d0   :  { %3250 = vmatprep.subr.bf16.mxu0 %v3482_v3 }
 0x3d3   :  { %3252 = vmatpush3.bf16.msra.mxu0 %v3618_v41 }
 0x3d4   :  { %3046 = vmatprep.subr.mxu0 %v3484_v10 }
 0x4a1   :  { %v456_v22 = vpop.f32.mrb[8].mxu0 }
 0x4a2   :  { %461 = vrot.lane.b32.xlu0 %v456_v22, %s3488_s0  ;;  %v3021_v23 = vpop.f32.mrb[9].mxu0 }
 0x514   :  { %v462_v24 = vpop.permute.xlu0 %461 }
 0x515   :  { %v464_v26 = vadd.f32 %v462_v24, %v367_v59 }
 0x517   :  { %v473_v27 = vadd.f32 %v471_v25, %v464_v26 }
 0x519   :  { %v2799_v28 = vmul.f32 -1.442695, %v473_v27 }
 0x51b   :  { %3366 = vpow2.f32 %v2799_v28 }
 0x525   :  { %v3367_v29 = vpop.eup %3366 }
 0x526   :  { %v477_v30 = vadd.f32 1.0, %v3367_v29 }
 0x528   :  { %3368 = vrcp.f32 %v477_v30  ;;  %v3491_v30 = vmov -1.0  }
 0x532   :  { %v3369_v32 = vpop.eup %3368 }
 0x533   :  { %v488_v34 = vmul.f32 %v3369_v32, %v3707_v31 }
 0x535   :  { %v497_v36 = vadd.f32 %v3709_v33, %v488_v34 }
 0x537   :  { %499 = vrot.lane.b32.xlu0 %v497_v36, %s3487_s17 }
 0x5a9   :  { %v3719_v38 = vpop.permute.xlu0 %499 }
 0x5aa   :  { %vm502_vm5 = vcmp.lt.f32.partialorder %v3717_v37, %v3719_v38 }
 0x5ab   :  { %v506_v40 = vsel %vm502_vm5, 1.0, %v3484_v10  ;;  %v3783_v32 = vsel %vm502_vm5, 0.0, %v3491_v30  ;;  %v505_v62 = vsel %vm502_vm5, %v3681_v1, 0.0 }
 0x5ac   :  { %512 = vrot.lane.b32.xlu1 %v506_v40, %s3486_s21  ;;  %v521_v34 = vsel %vm384_vm4, %v3783_v32, inf  ;;  %vm814_vm8 = vcmp.eq.f32.partialorder %v505_v62, 0.0  ;;  %vm827_vm14 = vcmp.eq.f32.partialorder %v3783_v32, -1.0 }
 0x61e   :  { %v513_v42 = vpop.permute.xlu1 %512 }
 0x61f   :  { %v3730_v43 = vsel %vm298_vm3, %v3625_v45, %v513_v42 }
 0x620   :  { %3033 = vmatmul.mubr.msk.f32.vlgmr.msra.gmra.mrb[4].mxu1 %vm191_vm6, %v3730_v43  ;;  %vm817_vm7 = vcmp.eq.f32.partialorder %v3730_v43, 0.0 }
 0x621   :  { %3255 = vmatpush3.bf16.msra.mxu1 %v3543_v4  ;;  %3061 = vmatprep.mubr.msk.f32.mxu1 %vm3483_vm1, %v3484_v10  ;;  %v818_v20 = vsel %vm817_vm7, 1, %v3489_v14 }
 0x622   :  { %3256 = vmatprep.subr.bf16.mxu1 %v3482_v3 }
 0x625   :  { %3258 = vmatpush3.bf16.msra.mxu1 %v3561_v11 }
 0x626   :  { %3059 = vmatprep.subr.mxu1 %v3484_v10 }
 0x629   :  { %3060 = vmatpush3.msk.msra.mxu1 %vm195_vm2, %v3574_v13 }
 0x62a   :  { %3075 = vmatprep.subr.mxu1 %v3484_v10 }
 0x6f3   :  { %v602_v45 = vpop.f32.mrb[4].mxu1 }
 0x6f4   :  { %v606_v46 = vadd.f32 %v602_v45, %v156_v44  ;;  %v3034_v47 = vpop.f32.mrb[5].mxu1 }
 0x6f6   :  { %v2802_v49 = vmul.f32 -1.442695, %v606_v46 }
 0x6f8   :  { %3370 = vpow2.f32 %v2802_v49 }
 0x702   :  { %v3371_v50 = vpop.eup %3370 }
 0x703   :  { %v610_v51 = vadd.f32 1.0, %v3371_v50 }
 0x705   :  { %3372 = vrcp.f32 %v610_v51 }
 0x70f   :  { %v3373_v52 = vpop.eup %3372 }
 0x710   :  { %v613_v53 = vmul.f32 2.0, %v3373_v52  ;;  %v615_v59 = vmul.f32 %v3373_v52, %v3600_v35 }
 0x712   :  { %v2803_v54 = vadd.f32 -1.0, %v613_v53 }
 0x714   :  { %617 = vrot.lane.b32.xlu0 %v2803_v54, %s3485_s20 }
 0x786   :  { %v618_v55 = vpop.permute.xlu0 %617 }
 0x787   :  { %v620_v56 = vmul.f32 %v3373_v52, %v618_v55 }
 0x789   :  { %622 = vrot.lane.b32.xlu1 %v620_v56, %s3486_s21 }
 0x7fb   :  { %v623_v19 = vpop.permute.xlu1 %622 }
 0x7fc   :  { %v3748_v60 = vadd.f32 %v623_v19, %v615_v59 }
 0x7fe   :  { %3374 = vtanh.f32 %v3748_v60 }
 0x808   :  { %v3375_v61 = vpop.eup %3374 }
 0x809   :  { %628 = vrot.lane.b32.xlu0 %v3375_v61, %s3485_s20 }
 0x87b   :  { %v629_v63 = vpop.permute.xlu0 %628 }
 0x87c   :  { %v631_v0 = vmul.f32 %v3373_v52, %v629_v63  ;;  %v36_v63 = vld [vmem:[%s4410_s1 + $0x8] sm:$0xff] }
 0x87e   :  { %633 = vrot.lane.b32.xlu1 %v631_v0, %s3486_s21 }
 0x882   :  { %797 = vrot.lane.b32.xlu1 %v795_v12, %s3488_s0 }
 0x886   :  { %819 = vrot.lane.b32.xlu1 %v818_v20, %s3490_s24 }
 0x8f0   :  { %v3759_v21 = vpop.permute.xlu1 %633 }
 0x8f1   :  { %3044 = vmatmul.mubr.msk.f32.vlgmr.msra.gmra.mrb[10].mxu0 %vm298_vm3, %v3759_v21 }
 0x8f2   :  { %3047 = vmatpush3.msk.msra.mxu0 %vm195_vm2, %v3647_v48  ;;  %3048 = vmatprep.mubr.msk.f32.mxu0 %vm3483_vm1, %v3484_v10 }
 0x8f3   :  { %3259 = vmatprep.subr.bf16.mxu0 %v3482_v3 }
 0x8f4   :  { %v798_v42 = vpop.permute.xlu1 %797 }
 0x8f8   :  { %v820_v61 = vpop.permute.xlu1 %819 }
 0x8f9   :  { %vm821_vm11 = vcmp.ne.s32.totalorder %v820_v61, 0 }
 0x9c4   :  { %v703_v17 = vpop.f32.mrb[10].mxu0 }
 0x9c5   :  { %v707_v22 = vadd.f32 %v703_v17, %v3678_v58  ;;  %v3045_v23 = vpop.f32.mrb[11].mxu0 }
 0x9c7   :  { %v2805_v24 = vmul.f32 -1.442695, %v707_v22 }
 0x9c9   :  { %3376 = vpow2.f32 %v2805_v24 }
 0x9d3   :  { %v3377_v25 = vpop.eup %3376 }
 0x9d4   :  { %v711_v26 = vadd.f32 1.0, %v3377_v25 }
 0x9d6   :  { %3378 = vrcp.f32 %v711_v26  ;;  %v161_v26 = vadd.f32 %v3693_v5, %v3593_v18 }
 0x9e0   :  { %v3769_v27 = vpop.eup %3378 }
 0x9e1   :  { %3049 = vmatmul.mubr.msk.f32.vlgmr.msra.gmra.mrb[12].mxu0 %vm384_vm4, %v3769_v27 }
 0x9e2   :  { %3261 = vmatpush3.bf16.msra.mxu0 %v3612_v39  ;;  %3072 = vmatprep.mubr.msk.f32.mxu0 %vm3483_vm1, %v3484_v10 }
 0x9e3   :  { %3262 = vmatprep.subr.bf16.mxu0 %v3482_v3 }
 0x9e6   :  { %3264 = vmatpush3.bf16.msra.mxu0 %v3618_v41 }
 0x9e7   :  { %3265 = vmatprep.subr.bf16.mxu0 %v3482_v3 }
 0xab4   :  { %v783_v28 = vpop.f32.mrb[12].mxu0 }
 0xab5   :  { %788 = vrot.lane.b32.xlu0 %v783_v28, %s3488_s0  ;;  %v3050_v29 = vpop.f32.mrb[13].mxu0 }
 0xad4   :  { %522 = vmin.xlane.f32.xlu0 %v521_v34 }
 0xb27   :  { %v789_v36 = vpop.permute.xlu0 %788 }
 0xb28   :  { %v791_v40 = vadd.f32 %v789_v36, %v703_v17 }
 0xb2a   :  { %v800_v44 = vadd.f32 %v798_v42, %v791_v40 }
 0xb2c   :  { %v2808_v45 = vmul.f32 -1.442695, %v800_v44 }
 0xb2e   :  { %3380 = vpow2.f32 %v2808_v45 }
 0xb38   :  { %v3381_v46 = vpop.eup %3380 }
 0xb39   :  { %v804_v47 = vadd.f32 1.0, %v3381_v46 }
 0xb3b   :  { %3382 = vrcp.f32 %v804_v47 }
 0xb45   :  { %v3383_v49 = vpop.eup %3382 }
 0xb46   :  { %v807_v50 = vmul.f32 %v3383_v49, %v3707_v31 }
 0xb48   :  { %v808_v51 = vadd.f32 %v807_v50, %v3709_v33 }
 0xb4a   :  { %810 = vrot.lane.b32.xlu1 %v808_v51, %s3487_s17 }
 0xb4e   :  { %823 = vrot.lane.b32.xlu1 %v3730_v43, %s3490_s24 }
 0xb61   :  { %v523_v52 = vpop.xlane.xlu0 %522 }
 0xb62   :  { %v524_v53 = vrot.slane %v523_v52, 4 }
 0xb64   :  { %v525_v54 = vmin.f32 %v523_v52, %v524_v53  ;;  %v3843_v52 = vld [vmem:[%s4414_s5 + $0x8] sm:$0x3f] }
 0xb66   :  { %v526_v55 = vrot.slane %v525_v54, 2 }
 0xb68   :  { %v527_v56 = vmin.f32 %v525_v54, %v526_v55 }
 0xb6a   :  { %v528_v59 = vrot.slane %v527_v56, 1 }
 0xb6c   :  { %v529_v19 = vmin.f32 %v527_v56, %v528_v59 }
 0xb6e   :  { %3329 = vpush %v529_v19 }
 0xb9f   :  { %s3330_s25 = spop %3329 }
 0xba0   :  { %v531_v0 = vstv %s3330_s25 }
 0xba1   :  { %vm3800_vm12 = vcmp.lt.f32.partialorder %v531_v0, 0.0 }
 0xba2   :  { %v3833_v5 = vsel %vm3800_vm12, %v3748_v60, %v3600_v35  ;;  %v1115_v35 = vrot.slane %v3843_v52, %v57_v16 }
 0xbbc   :  { %v811_v12 = vpop.permute.xlu1 %810 }
 0xbbd   :  { %vm813_vm9 = vcmp.lt.f32.partialorder %v36_v63, %v811_v12 }
 0xbbe   :  { %vm815_vm10 = vmand %vm813_vm9, %vm814_vm8 }
 0xbbf   :  { %v816_v17 = vsel %vm815_vm10, %v3769_v27, %v505_v62  ;;  %vm822_vm13 = vmand %vm813_vm9, %vm821_vm11 }
 0xbc0   :  { %v824_v37 = vpop.permute.xlu1 %823  ;;  %v3808_v38 = vsel %vm3800_vm12, %v816_v17, %v505_v62  ;;  %vm828_vm15 = vmand %vm827_vm14, %vm813_vm9 }
 0xbc1   :  { %v826_v22 = vsel %vm822_vm13, 1.0, %v824_v37  ;;  %v829_v60 = vsel %vm828_vm15, 1.0, %v3783_v32  ;;  %vm1134_vm5 = vcmp.eq.f32.partialorder %v3808_v38, 0.0 }
 0xbc2   :  { %832 = vrot.lane.b32.xlu1 %v826_v22, %s3486_s21  ;;  %v3856_v54 = vsel %vm3800_vm12, %v829_v60, %v3783_v32 }
 0xbc3   :  { %v841_v55 = vsel %vm384_vm4, %v3856_v54, inf  ;;  %vm1147_vm14 = vcmp.eq.f32.partialorder %v3856_v54, -1.0 }
 0xc34   :  { %v833_v23 = vpop.permute.xlu1 %832 }
 0xc35   :  { %v835_v24 = vsel %vm298_vm3, %v3759_v21, %v833_v23 }
 0xc36   :  { %v3816_v25 = vsel %vm3800_vm12, %v835_v24, %v3730_v43 }
 0xc37   :  { %3062 = vmatmul.mubr.msk.f32.vlgmr.msra.gmra.mrb[6].mxu1 %vm191_vm6, %v3816_v25  ;;  %vm1137_vm0 = vcmp.eq.f32.partialorder %v3816_v25, 0.0 }
 0xc38   :  { %3076 = vmatpush3.msk.msra.mxu1 %vm195_vm2, %v3647_v48  ;;  %3077 = vmatprep.mubr.msk.f32.mxu1 %vm3483_vm1, %v3484_v10 }
 0xc39   :  { %3271 = vmatprep.subr.bf16.mxu1 %v3482_v3 }
 0xd0a   :  { %v922_v21 = vpop.f32.mrb[6].mxu1 }
 0xd0b   :  { %v926_v28 = vadd.f32 %v922_v21, %v161_v26  ;;  %v3063_v29 = vpop.f32.mrb[7].mxu1 }
 0xd0c   :  { %v1138_v29 = vsel %vm1137_vm0, 1, %v3489_v14 }
 0xd0d   :  { %v2811_v30 = vmul.f32 -1.442695, %v926_v28 }
 0xd0f   :  { %3384 = vpow2.f32 %v2811_v30 }
 0xd19   :  { %v3385_v43 = vpop.eup %3384 }
 0xd1a   :  { %v930_v34 = vadd.f32 1.0, %v3385_v43 }
 0xd1c   :  { %3386 = vrcp.f32 %v930_v34 }
 0xd26   :  { %v3387_v36 = vpop.eup %3386 }
 0xd27   :  { %v933_v40 = vmul.f32 2.0, %v3387_v36  ;;  %v935_v46 = vmul.f32 %v3387_v36, %v3833_v5 }
 0xd29   :  { %v2812_v42 = vadd.f32 -1.0, %v933_v40 }
 0xd2b   :  { %937 = vrot.lane.b32.xlu1 %v2812_v42, %s3485_s20 }
 0xd9d   :  { %v938_v44 = vpop.permute.xlu1 %937 }
 0xd9e   :  { %v940_v45 = vmul.f32 %v3387_v36, %v938_v44 }
 0xda0   :  { %942 = vrot.lane.b32.xlu1 %v940_v45, %s3486_s21 }
 0xe12   :  { %v943_v47 = vpop.permute.xlu1 %942 }
 0xe13   :  { %v3836_v49 = vadd.f32 %v943_v47, %v935_v46 }
 0xe15   :  { %3388 = vtanh.f32 %v3836_v49 }
 0xe1f   :  { %v3389_v50 = vpop.eup %3388 }
 0xe20   :  { %948 = vrot.lane.b32.xlu1 %v3389_v50, %s3485_s20  ;;  %v3896_v50 = vld [vmem:[%s4410_s1 + $0x10] sm:$0xff] }
 0xe92   :  { %v949_v51 = vpop.permute.xlu1 %948 }
 0xe93   :  { %v951_v53 = vmul.f32 %v3387_v36, %v949_v51 }
 0xe95   :  { %953 = vrot.lane.b32.xlu1 %v951_v53, %s3486_s21 }
 0xe99   :  { %1117 = vrot.lane.b32.xlu1 %v1115_v35, %s3488_s0 }
 0xebd   :  { %842 = vmin.xlane.f32.xlu1 %v841_v55 }
 0xf07   :  { %v3860_v56 = vpop.permute.xlu1 %953 }
 0xf08   :  { %3073 = vmatmul.mubr.msk.f32.vlgmr.msra.gmra.mrb[14].mxu0 %vm298_vm3, %v3860_v56 }
 0xf09   :  { %3267 = vmatpush3.bf16.msra.mxu0 %v3543_v4  ;;  %3090 = vmatprep.mubr.msk.f32.mxu0 %vm3483_vm1, %v3484_v10 }
 0xf0a   :  { %3268 = vmatprep.subr.bf16.mxu0 %v3482_v3 }
 0xf0b   :  { %v1118_v16 = vpop.permute.xlu1 %1117 }
 0xf0d   :  { %3270 = vmatpush3.bf16.msra.mxu0 %v3561_v11 }
 0xf0e   :  { %3088 = vmatprep.subr.mxu0 %v3484_v10 }
 0xf11   :  { %3089 = vmatpush3.msk.msra.mxu0 %vm195_vm2, %v3574_v13 }
 0xf12   :  { %3104 = vmatprep.subr.mxu0 %v3484_v10 }
 0xf4a   :  { %v843_v32 = vpop.xlane.xlu1 %842 }
 0xf4b   :  { %v844_v59 = vrot.slane %v843_v32, 4 }
 0xf4d   :  { %v845_v19 = vmin.f32 %v843_v32, %v844_v59 }
 0xf4f   :  { %v846_v61 = vrot.slane %v845_v19, 2 }
 0xf51   :  { %v847_v62 = vmin.f32 %v845_v19, %v846_v61 }
 0xf53   :  { %v848_v63 = vrot.slane %v847_v62, 1 }
 0xf55   :  { %v849_v0 = vmin.f32 %v847_v62, %v848_v63 }
 0xf57   :  { %3331 = vpush %v849_v0 }
 0xf88   :  { %s3332_s4 = spop %3331 }
 0xf89   :  { %v851_v51 = vstv %s3332_s4 }
 0xf8a   :  { %vm3906_vm9 = vcmp.lt.f32.partialorder %v851_v51, 0.0 }
 0xfdb   :  { %v1023_v12 = vpop.f32.mrb[14].mxu0 }
 0xfdc   :  { %v1027_v17 = vadd.f32 %v1023_v12, %v3678_v58  ;;  %v3074_v37 = vpop.f32.mrb[15].mxu0 }
 0xfde   :  { %v2814_v22 = vmul.f32 -1.442695, %v1027_v17 }
 0xfe0   :  { %3390 = vpow2.f32 %v2814_v22 }
 0xfea   :  { %v3391_v23 = vpop.eup %3390 }
 0xfeb   :  { %v1031_v24 = vadd.f32 1.0, %v3391_v23 }
 0xfed   :  { %3392 = vrcp.f32 %v1031_v24 }
 0xff7   :  { %v3874_v26 = vpop.eup %3392 }
 0xff8   :  { %3078 = vmatmul.mubr.msk.f32.vlgmr.msra.gmra.mrb[8].mxu1 %vm384_vm4, %v3874_v26 }
 0xff9   :  { %3273 = vmatpush3.bf16.msra.mxu1 %v3612_v39  ;;  %3101 = vmatprep.mubr.msk.f32.mxu1 %vm3483_vm1, %v3484_v10 }
 0xffa   :  { %3274 = vmatprep.subr.bf16.mxu1 %v3482_v3 }
 0xffd   :  { %3276 = vmatpush3.bf16.msra.mxu1 %v3618_v41 }
 0xffe   :  { %3277 = vmatprep.subr.bf16.mxu1 %v3482_v3 }
0x10cb   :  { %v1103_v21 = vpop.f32.mrb[8].mxu1 }
0x10cc   :  { %1108 = vrot.lane.b32.xlu0 %v1103_v21, %s3488_s0  ;;  %v3079_v28 = vpop.f32.mrb[9].mxu1  ;;  %v3946_v21 = vsel %vm3906_vm9, %v3836_v49, %v3833_v5 }
0x10d0   :  { %1139 = vrot.lane.b32.xlu0 %v1138_v29, %s3490_s24 }
0x113e   :  { %v1109_v30 = vpop.permute.xlu0 %1108 }
0x113f   :  { %v1111_v43 = vadd.f32 %v1109_v30, %v1023_v12 }
0x1141   :  { %v1120_v34 = vadd.f32 %v1118_v16, %v1111_v43 }
0x1142   :  { %v1140_v47 = vpop.permute.xlu0 %1139 }
0x1143   :  { %v2817_v36 = vmul.f32 -1.442695, %v1120_v34  ;;  %vm1141_vm10 = vcmp.ne.s32.totalorder %v1140_v47, 0 }
0x1145   :  { %3394 = vpow2.f32 %v2817_v36 }
0x114f   :  { %v3395_v40 = vpop.eup %3394 }
0x1150   :  { %v1124_v42 = vadd.f32 1.0, %v3395_v40 }
0x1152   :  { %3396 = vrcp.f32 %v1124_v42 }
0x115c   :  { %v3397_v44 = vpop.eup %3396 }
0x115d   :  { %v1127_v45 = vmul.f32 %v3397_v44, %v3707_v31 }
0x115f   :  { %v1128_v46 = vadd.f32 %v1127_v45, %v3709_v33 }
0x1161   :  { %1130 = vrot.lane.b32.xlu0 %v1128_v46, %s3487_s17 }
0x1165   :  { %1143 = vrot.lane.b32.xlu0 %v3816_v25, %s3490_s24 }
0x11d3   :  { %v3898_v53 = vpop.permute.xlu0 %1130 }
0x11d4   :  { %vm1133_vm7 = vcmp.lt.f32.partialorder %v3896_v50, %v3898_v53 }
0x11d5   :  { %vm1135_vm8 = vmand %vm1133_vm7, %vm1134_vm5 }
0x11d6   :  { %v1136_v60 = vsel %vm1135_vm8, %v3874_v26, %v3808_v38  ;;  %vm1142_vm11 = vmand %vm1133_vm7, %vm1141_vm10 }
0x11d7   :  { %v1144_v55 = vpop.permute.xlu0 %1143  ;;  %v3918_v16 = vsel %vm3906_vm9, %v1136_v60, %v3808_v38  ;;  %v166_v38 = vadd.f32 %v3691_v2, %v3593_v18  ;;  %v1435_v60 = vrot.slane %v3843_v52, %v373_v57  ;;  %vm1148_vm15 = vmand %vm1147_vm14, %vm1133_vm7 }
0x11d8   :  { %v1146_v32 = vsel %vm1142_vm11, 1.0, %v1144_v55  ;;  %v1149_v55 = vsel %vm1148_vm15, 2.0, %v3856_v54  ;;  %vm1454_vm0 = vcmp.eq.f32.partialorder %v3918_v16, 0.0 }
0x11d9   :  { %1152 = vrot.lane.b32.xlu0 %v1146_v32, %s3486_s21  ;;  %v3991_v32 = vsel %vm3906_vm9, %v1149_v55, %v3856_v54 }
0x124b   :  { %v1153_v59 = vpop.permute.xlu0 %1152 }
0x124c   :  { %v1155_v19 = vsel %vm298_vm3, %v3860_v56, %v1153_v59  ;;  %v1161_v59 = vsel %vm384_vm4, %v3991_v32, inf }
0x124d   :  { %v3926_v61 = vsel %vm3906_vm9, %v1155_v19, %v3816_v25 }
0x124e   :  { %3091 = vmatmul.mubr.msk.f32.vlgmr.msra.gmra.mrb[16].mxu0 %vm191_vm6, %v3926_v61  ;;  %vm1457_vm13 = vcmp.eq.f32.partialorder %v3926_v61, 0.0 }
0x124f   :  { %3105 = vmatpush3.msk.msra.mxu0 %vm195_vm2, %v3647_v48  ;;  %3106 = vmatprep.mubr.msk.f32.mxu0 %vm3483_vm1, %v3484_v10  ;;  %v1458_v2 = vsel %vm1457_vm13, 1, %v3489_v14  ;;  %vm1467_vm13 = vcmp.eq.f32.partialorder %v3991_v32, -1.0 }
0x1250   :  { %3283 = vmatprep.subr.bf16.mxu0 %v3482_v3 }
0x1321   :  { %v1242_v56 = vpop.f32.mrb[16].mxu0 }
0x1322   :  { %v1246_v62 = vadd.f32 %v1242_v56, %v166_v38  ;;  %v3092_v63 = vpop.f32.mrb[17].mxu0 }
0x1324   :  { %v2820_v0 = vmul.f32 -1.442695, %v1246_v62 }
0x1326   :  { %3398 = vpow2.f32 %v2820_v0 }
0x1330   :  { %v3399_v25 = vpop.eup %3398 }
0x1331   :  { %v1250_v12 = vadd.f32 1.0, %v3399_v25 }
0x1333   :  { %3400 = vrcp.f32 %v1250_v12 }
0x133d   :  { %v3401_v17 = vpop.eup %3400 }
0x133e   :  { %v1253_v37 = vmul.f32 2.0, %v3401_v17  ;;  %v1255_v28 = vmul.f32 %v3401_v17, %v3946_v21 }
0x1340   :  { %v2821_v22 = vadd.f32 -1.0, %v1253_v37 }
0x1342   :  { %1257 = vrot.lane.b32.xlu0 %v2821_v22, %s3485_s20 }
0x13b4   :  { %v1258_v23 = vpop.permute.xlu0 %1257 }
0x13b5   :  { %v1260_v24 = vmul.f32 %v3401_v17, %v1258_v23 }
0x13b7   :  { %1262 = vrot.lane.b32.xlu1 %v1260_v24, %s3486_s21 }
0x13bb   :  { %1459 = vrot.lane.b32.xlu1 %v1458_v2, %s3490_s24 }
0x1429   :  { %v1263_v29 = vpop.permute.xlu1 %1262 }
0x142a   :  { %v3949_v30 = vadd.f32 %v1263_v29, %v1255_v28  ;;  %v38_v28 = vld [vmem:[%s4410_s1 + $0x18] sm:$0xff] }
0x142c   :  { %3402 = vtanh.f32 %v3949_v30 }
0x142d   :  { %v1460_v2 = vpop.permute.xlu1 %1459 }
0x142e   :  { %vm1461_vm8 = vcmp.ne.s32.totalorder %v1460_v2, 0 }
0x1436   :  { %v3403_v43 = vpop.eup %3402 }
0x1437   :  { %1268 = vrot.lane.b32.xlu0 %v3403_v43, %s3485_s20 }
0x14a9   :  { %v1269_v34 = vpop.permute.xlu0 %1268 }
0x14aa   :  { %v1271_v36 = vmul.f32 %v3401_v17, %v1269_v34 }
0x14ac   :  { %1273 = vrot.lane.b32.xlu0 %v1271_v36, %s3486_s21 }
0x151e   :  { %v3954_v40 = vpop.permute.xlu0 %1273 }
0x151f   :  { %3102 = vmatmul.mubr.msk.f32.vlgmr.msra.gmra.mrb[10].mxu1 %vm298_vm3, %v3954_v40 }
0x1520   :  { %3279 = vmatpush3.bf16.msra.mxu1 %v3543_v4  ;;  %3119 = vmatprep.mubr.msk.f32.mxu1 %vm3483_vm1, %v3484_v10 }
0x1521   :  { %3280 = vmatprep.subr.bf16.mxu1 %v3482_v3 }
0x1524   :  { %3282 = vmatpush3.bf16.msra.mxu1 %v3561_v11 }
0x1525   :  { %3117 = vmatprep.subr.mxu1 %v3484_v10 }
0x1528   :  { %3118 = vmatpush3.msk.msra.mxu1 %vm195_vm2, %v3574_v13 }
0x1529   :  { %3133 = vmatprep.subr.mxu1 %v3484_v10 }
0x15f2   :  { %v1343_v5 = vpop.f32.mrb[10].mxu1 }
0x15f3   :  { %v1347_v49 = vadd.f32 %v1343_v5, %v3678_v58  ;;  %v3103_v42 = vpop.f32.mrb[11].mxu1 }
0x15f5   :  { %v2823_v44 = vmul.f32 -1.442695, %v1347_v49 }
0x15f7   :  { %3404 = vpow2.f32 %v2823_v44 }
0x1601   :  { %v3405_v45 = vpop.eup %3404 }
0x1602   :  { %v1351_v46 = vadd.f32 1.0, %v3405_v45 }
0x1604   :  { %3406 = vrcp.f32 %v1351_v46 }
0x160e   :  { %v3968_v47 = vpop.eup %3406 }
0x160f   :  { %3107 = vmatmul.mubr.msk.f32.vlgmr.msra.gmra.mrb[18].mxu0 %vm384_vm4, %v3968_v47 }
0x1610   :  { %3285 = vmatpush3.bf16.msra.mxu0 %v3612_v39  ;;  %3130 = vmatprep.mubr.msk.f32.mxu0 %vm3483_vm1, %v3484_v10 }
0x1611   :  { %3286 = vmatprep.subr.bf16.mxu0 %v3482_v3 }
0x1614   :  { %3288 = vmatpush3.bf16.msra.mxu0 %v3618_v41 }
0x1615   :  { %3289 = vmatprep.subr.bf16.mxu0 %v3482_v3 }
0x16e2   :  { %v1423_v13 = vpop.f32.mrb[18].mxu0 }
0x16e3   :  { %1428 = vrot.lane.b32.xlu0 %v1423_v13, %s3488_s0  ;;  %v3108_v51 = vpop.f32.mrb[19].mxu0 }
0x16e7   :  { %1437 = vrot.lane.b32.xlu0 %v1435_v60, %s3488_s0 }
0x1706   :  { %1162 = vmin.xlane.f32.xlu0 %v1161_v59 }
0x1755   :  { %v1429_v57 = vpop.permute.xlu0 %1428 }
0x1756   :  { %v1431_v19 = vadd.f32 %v1429_v57, %v1343_v5 }
0x1759   :  { %v1438_v38 = vpop.permute.xlu0 %1437 }
0x175a   :  { %v1440_v56 = vadd.f32 %v1438_v38, %v1431_v19 }
0x175c   :  { %v2826_v62 = vmul.f32 -1.442695, %v1440_v56 }
0x175e   :  { %3408 = vpow2.f32 %v2826_v62 }
0x1768   :  { %v3409_v63 = vpop.eup %3408 }
0x1769   :  { %v1444_v50 = vadd.f32 1.0, %v3409_v63 }
0x176b   :  { %3410 = vrcp.f32 %v1444_v50 }
0x1775   :  { %v3411_v53 = vpop.eup %3410 }
0x1776   :  { %v1447_v0 = vmul.f32 %v3411_v53, %v3707_v31 }
0x1778   :  { %v1448_v25 = vadd.f32 %v1447_v0, %v3709_v33  ;;  %v1754_v0 = vsub.s32 2, %v3582_v15 }
0x177a   :  { %1450 = vrot.lane.b32.xlu1 %v1448_v25, %s3487_s17 }
0x177e   :  { %1463 = vrot.lane.b32.xlu1 %v3926_v61, %s3490_s24 }
0x1793   :  { %v1163_v54 = vpop.xlane.xlu0 %1162 }
0x1794   :  { %v1164_v12 = vrot.slane %v1163_v54, 4 }
0x1796   :  { %v1165_v17 = vmin.f32 %v1163_v54, %v1164_v12  ;;  %v1755_v12 = vrot.slane %v3843_v52, %v1754_v0 }
0x1798   :  { %v1166_v37 = vrot.slane %v1165_v17, 2 }
0x179a   :  { %v1167_v22 = vmin.f32 %v1165_v17, %v1166_v37 }
0x179c   :  { %v1168_v23 = vrot.slane %v1167_v22, 1 }
0x179e   :  { %v1169_v24 = vmin.f32 %v1167_v22, %v1168_v23 }
0x17a0   :  { %3333 = vpush %v1169_v24 }
0x17d1   :  { %s3334_s9 = spop %3333 }
0x17d2   :  { %v1171_v29 = vstv %s3334_s9 }
0x17d3   :  { %vm4005_vm10 = vcmp.lt.f32.partialorder %v1171_v29, 0.0 }
0x17ec   :  { %v1451_v43 = vpop.permute.xlu1 %1450 }
0x17ed   :  { %vm1453_vm5 = vcmp.lt.f32.partialorder %v38_v28, %v1451_v43 }
0x17ee   :  { %vm1455_vm7 = vmand %vm1453_vm5, %vm1454_vm0 }
0x17ef   :  { %v1456_v36 = vsel %vm1455_vm7, %v3968_v47, %v3918_v16  ;;  %vm1462_vm11 = vmand %vm1453_vm5, %vm1461_vm8 }
0x17f0   :  { %v1464_v5 = vpop.permute.xlu1 %1463  ;;  %v4015_v49 = vsel %vm4005_vm10, %v1456_v36, %v3918_v16  ;;  %v171_v16 = vadd.f32 %v3697_v7, %v3593_v18  ;;  %v4040_v7 = vsel %vm4005_vm10, %v3949_v30, %v3946_v21  ;;  %vm1468_vm14 = vmand %vm1467_vm13, %vm1453_vm5 }
0x17f1   :  { %v1466_v42 = vsel %vm1462_vm11, 1.0, %v1464_v5  ;;  %v1469_v21 = vsel %vm1468_vm14, 3.0, %v3991_v32  ;;  %vm1774_vm0 = vcmp.eq.f32.partialorder %v4015_v49, 0.0 }
0x17f2   :  { %1472 = vrot.lane.b32.xlu1 %v1466_v42, %s3486_s21  ;;  %v4057_v30 = vsel %vm4005_vm10, %v1469_v21, %v3991_v32  ;;  %v4074_v32 = vld [vmem:[%s4412_s3 + $0x20] sm:$0xf] }
0x17f3   :  { %v1481_v17 = vsel %vm384_vm4, %v4057_v30, inf }
0x1864   :  { %v1473_v44 = vpop.permute.xlu1 %1472 }
0x1865   :  { %v1475_v45 = vsel %vm298_vm3, %v3954_v40, %v1473_v44 }
0x1866   :  { %v4023_v46 = vsel %vm4005_vm10, %v1475_v45, %v3926_v61 }
0x1867   :  { %3120 = vmatmul.mubr.msk.f32.vlgmr.msra.gmra.mrb[12].mxu1 %vm191_vm6, %v4023_v46  ;;  %vm1777_vm15 = vcmp.eq.f32.partialorder %v4023_v46, 0.0 }
0x1868   :  { %3134 = vmatpush3.msk.msra.mxu1 %vm195_vm2, %v3647_v48  ;;  %3135 = vmatprep.mubr.msk.f32.mxu1 %vm3483_vm1, %v3484_v10 }
0x1869   :  { %3295 = vmatprep.subr.bf16.mxu1 %v3482_v3 }
0x193a   :  { %v1562_v40 = vpop.f32.mrb[12].mxu1 }
0x193b   :  { %v1566_v13 = vadd.f32 %v1562_v40, %v171_v16  ;;  %v3121_v51 = vpop.f32.mrb[13].mxu1 }
0x193d   :  { %v2829_v60 = vmul.f32 -1.442695, %v1566_v13 }
0x193f   :  { %3412 = vpow2.f32 %v2829_v60 }
0x1949   :  { %v3413_v61 = vpop.eup %3412 }
0x194a   :  { %v1570_v55 = vadd.f32 1.0, %v3413_v61  ;;  %v1778_v61 = vsel %vm1777_vm15, 1, %v3489_v14  ;;  %vm1787_vm15 = vcmp.eq.f32.partialorder %v4057_v30, -1.0 }
0x194c   :  { %3414 = vrcp.f32 %v1570_v55 }
0x1956   :  { %v3415_v59 = vpop.eup %3414 }
0x1957   :  { %v1573_v57 = vmul.f32 2.0, %v3415_v59  ;;  %v1575_v62 = vmul.f32 %v3415_v59, %v4040_v7 }
0x1959   :  { %v2830_v19 = vadd.f32 -1.0, %v1573_v57 }
0x195b   :  { %1577 = vrot.lane.b32.xlu1 %v2830_v19, %s3485_s20 }
0x19cd   :  { %v1578_v38 = vpop.permute.xlu1 %1577 }
0x19ce   :  { %v1580_v56 = vmul.f32 %v3415_v59, %v1578_v38 }
0x19d0   :  { %1582 = vrot.lane.b32.xlu1 %v1580_v56, %s3486_s21 }
0x1a42   :  { %v1583_v63 = vpop.permute.xlu1 %1582 }
0x1a43   :  { %v4043_v50 = vadd.f32 %v1583_v63, %v1575_v62 }
0x1a45   :  { %3416 = vtanh.f32 %v4043_v50 }
0x1a4f   :  { %v3417_v53 = vpop.eup %3416 }
0x1a50   :  { %1588 = vrot.lane.b32.xlu1 %v3417_v53, %s3485_s20 }
0x1ac2   :  { %v1589_v25 = vpop.permute.xlu1 %1588 }
0x1ac3   :  { %v1591_v54 = vmul.f32 %v3415_v59, %v1589_v25  ;;  %v4102_v25 = vld [vmem:[%s4410_s1 + $0x20] sm:$0xff] }
0x1ac5   :  { %1593 = vrot.lane.b32.xlu1 %v1591_v54, %s3486_s21 }
0x1ac9   :  { %1757 = vrot.lane.b32.xlu1 %v1755_v12, %s3488_s0 }
0x1aed   :  { %1482 = vmin.xlane.f32.xlu1 %v1481_v17 }
0x1b37   :  { %v4061_v37 = vpop.permute.xlu1 %1593 }
0x1b38   :  { %3131 = vmatmul.mubr.msk.f32.vlgmr.msra.gmra.mrb[20].mxu0 %vm298_vm3, %v4061_v37 }
0x1b39   :  { %3291 = vmatpush3.bf16.msra.mxu0 %v3543_v4  ;;  %3148 = vmatprep.mubr.msk.f32.mxu0 %vm3483_vm1, %v3484_v10 }
0x1b3a   :  { %3292 = vmatprep.subr.bf16.mxu0 %v3482_v3 }
0x1b3b   :  { %v1758_v22 = vpop.permute.xlu1 %1757 }
0x1b3d   :  { %3294 = vmatpush3.bf16.msra.mxu0 %v3561_v11 }
0x1b3e   :  { %3146 = vmatprep.subr.mxu0 %v3484_v10 }
0x1b41   :  { %3147 = vmatpush3.msk.msra.mxu0 %vm195_vm2, %v4074_v32 }
0x1b42   :  { %3162 = vmatprep.subr.mxu0 %v3484_v10 }
0x1b7a   :  { %v1483_v23 = vpop.xlane.xlu1 %1482 }
0x1b7b   :  { %v1484_v24 = vrot.slane %v1483_v23, 4 }
0x1b7d   :  { %v1485_v2 = vmin.f32 %v1483_v23, %v1484_v24 }
0x1b7f   :  { %v1486_v28 = vrot.slane %v1485_v2, 2 }
0x1b81   :  { %v1487_v29 = vmin.f32 %v1485_v2, %v1486_v28 }
0x1b83   :  { %v1488_v43 = vrot.slane %v1487_v29, 1 }
0x1b85   :  { %v1489_v36 = vmin.f32 %v1487_v29, %v1488_v43 }
0x1b87   :  { %3335 = vpush %v1489_v36 }
0x1bb8   :  { %s3336_s3 = spop %3335 }
0x1bb9   :  { %v1491_v54 = vstv %s3336_s3 }
0x1bba   :  { %vm4112_vm8 = vcmp.lt.f32.partialorder %v1491_v54, 0.0 }
0x1c0b   :  { %v1663_v5 = vpop.f32.mrb[20].mxu0 }
0x1c0c   :  { %v1667_v42 = vadd.f32 %v1663_v5, %v3678_v58  ;;  %v3132_v44 = vpop.f32.mrb[21].mxu0 }
0x1c0e   :  { %v2832_v45 = vmul.f32 -1.442695, %v1667_v42 }
0x1c10   :  { %3418 = vpow2.f32 %v2832_v45 }
0x1c1a   :  { %v3419_v16 = vpop.eup %3418 }
0x1c1b   :  { %v1671_v40 = vadd.f32 1.0, %v3419_v16 }
0x1c1d   :  { %3420 = vrcp.f32 %v1671_v40 }
0x1c27   :  { %v4080_v13 = vpop.eup %3420 }
0x1c28   :  { %3136 = vmatmul.mubr.msk.f32.vlgmr.msra.gmra.mrb[14].mxu1 %vm384_vm4, %v4080_v13 }
0x1c29   :  { %3297 = vmatpush3.bf16.msra.mxu1 %v3612_v39  ;;  %3159 = vmatprep.mubr.msk.f32.mxu1 %vm3483_vm1, %v3484_v10 }
0x1c2a   :  { %3298 = vmatprep.subr.bf16.mxu1 %v3482_v3 }
0x1c2d   :  { %3300 = vmatpush3.bf16.msra.mxu1 %v3618_v41 }
0x1c2e   :  { %3301 = vmatprep.subr.bf16.mxu1 %v3482_v3 }
0x1cfb   :  { %v1743_v51 = vpop.f32.mrb[14].mxu1 }
0x1cfc   :  { %1748 = vrot.lane.b32.xlu0 %v1743_v51, %s3488_s0  ;;  %v3137_v60 = vpop.f32.mrb[15].mxu1 }
0x1cfd   :  { %v4152_v60 = vsel %vm4112_vm8, %v4043_v50, %v4040_v7 }
0x1d00   :  { %1779 = vrot.lane.b32.xlu0 %v1778_v61, %s3490_s24 }
0x1d6e   :  { %v1749_v55 = vpop.permute.xlu0 %1748 }
0x1d6f   :  { %v1751_v59 = vadd.f32 %v1749_v55, %v1663_v5 }
0x1d71   :  { %v1760_v57 = vadd.f32 %v1758_v22, %v1751_v59 }
0x1d72   :  { %v1780_v0 = vpop.permute.xlu0 %1779 }
0x1d73   :  { %v2835_v19 = vmul.f32 -1.442695, %v1760_v57  ;;  %vm1781_vm11 = vcmp.ne.s32.totalorder %v1780_v0, 0 }
0x1d75   :  { %3422 = vpow2.f32 %v2835_v19 }
0x1d7f   :  { %v3423_v38 = vpop.eup %3422 }
0x1d80   :  { %v1764_v56 = vadd.f32 1.0, %v3423_v38 }
0x1d82   :  { %3424 = vrcp.f32 %v1764_v56 }
0x1d8c   :  { %v3425_v62 = vpop.eup %3424 }
0x1d8d   :  { %v1767_v63 = vmul.f32 %v3425_v62, %v3707_v31 }
0x1d8f   :  { %v1768_v53 = vadd.f32 %v1767_v63, %v3709_v33 }
0x1d91   :  { %1770 = vrot.lane.b32.xlu0 %v1768_v53, %s3487_s17 }
0x1d95   :  { %1783 = vrot.lane.b32.xlu0 %v4023_v46, %s3490_s24 }
0x1e03   :  { %v4104_v12 = vpop.permute.xlu0 %1770 }
0x1e04   :  { %vm1773_vm5 = vcmp.lt.f32.partialorder %v4102_v25, %v4104_v12 }
0x1e05   :  { %vm1775_vm7 = vmand %vm1773_vm5, %vm1774_vm0 }
0x1e06   :  { %v1776_v17 = vsel %vm1775_vm7, %v4080_v13, %v4015_v49  ;;  %vm1782_vm13 = vmand %vm1773_vm5, %vm1781_vm11 }
0x1e07   :  { %v1784_v22 = vpop.permute.xlu0 %1783  ;;  %v4124_v23 = vsel %vm4112_vm8, %v1776_v17, %v4015_v49  ;;  %v176_v49 = vadd.f32 %v3695_v6, %v3593_v18  ;;  %v2074_v17 = vsub.s32 3, %v3582_v15  ;;  %vm1788_vm0 = vmand %vm1787_vm15, %vm1773_vm5 }
0x1e08   :  { %v1786_v24 = vsel %vm1782_vm13, 1.0, %v1784_v22  ;;  %vm2094_vm5 = vcmp.eq.f32.partialorder %v4124_v23, 0.0 }
0x1e09   :  { %1792 = vrot.lane.b32.xlu0 %v1786_v24, %s3486_s21 }
0x1e7b   :  { %v1793_v2 = vpop.permute.xlu0 %1792 }
0x1e7c   :  { %v1795_v28 = vsel %vm298_vm3, %v4061_v37, %v1793_v2  ;;  %v2075_v2 = vrot.slane %v3843_v52, %v2074_v17 }
0x1e7d   :  { %v4132_v29 = vsel %vm4112_vm8, %v1795_v28, %v4023_v46  ;;  %v1789_v28 = vsel %vm1788_vm0, 4.0, %v4057_v30 }
0x1e7e   :  { %3149 = vmatmul.mubr.msk.f32.vlgmr.msra.gmra.mrb[22].mxu0 %vm191_vm6, %v4132_v29  ;;  %vm2097_vm14 = vcmp.eq.f32.partialorder %v4132_v29, 0.0 }
0x1e7f   :  { %3163 = vmatpush3.msk.msra.mxu0 %vm195_vm2, %v3647_v48  ;;  %3164 = vmatprep.mubr.msk.f32.mxu0 %vm3483_vm1, %v3484_v10  ;;  %v2098_v6 = vsel %vm2097_vm14, 1, %v3489_v14 }
0x1e80   :  { %3307 = vmatprep.subr.bf16.mxu0 %v3482_v3 }
0x1f51   :  { %v1882_v37 = vpop.f32.mrb[22].mxu0 }
0x1f52   :  { %v1886_v43 = vadd.f32 %v1882_v37, %v176_v49  ;;  %v3150_v36 = vpop.f32.mrb[23].mxu0  ;;  %v4196_v49 = vsel %vm4112_vm8, %v1789_v28, %v4057_v30 }
0x1f53   :  { %v1801_v37 = vsel %vm384_vm4, %v4196_v49, inf  ;;  %vm2107_vm0 = vcmp.eq.f32.partialorder %v4196_v49, -1.0 }
0x1f54   :  { %v2838_v5 = vmul.f32 -1.442695, %v1886_v43 }
0x1f56   :  { %3426 = vpow2.f32 %v2838_v5 }
0x1f60   :  { %v3427_v46 = vpop.eup %3426 }
0x1f61   :  { %v1890_v42 = vadd.f32 1.0, %v3427_v46 }
0x1f63   :  { %3428 = vrcp.f32 %v1890_v42 }
0x1f6d   :  { %v3429_v44 = vpop.eup %3428 }
0x1f6e   :  { %v1893_v45 = vmul.f32 2.0, %v3429_v44  ;;  %v1895_v61 = vmul.f32 %v3429_v44, %v4152_v60 }
0x1f70   :  { %v2839_v16 = vadd.f32 -1.0, %v1893_v45 }
0x1f72   :  { %1897 = vrot.lane.b32.xlu0 %v2839_v16, %s3485_s20 }
0x1fe4   :  { %v1898_v40 = vpop.permute.xlu0 %1897 }
0x1fe5   :  { %v1900_v51 = vmul.f32 %v3429_v44, %v1898_v40 }
0x1fe7   :  { %1902 = vrot.lane.b32.xlu1 %v1900_v51, %s3486_s21 }
0x1feb   :  { %2099 = vrot.lane.b32.xlu1 %v2098_v6, %s3490_s24 }
0x2059   :  { %v1903_v55 = vpop.permute.xlu1 %1902 }
0x205a   :  { %v4155_v59 = vadd.f32 %v1903_v55, %v1895_v61 }
0x205c   :  { %3430 = vtanh.f32 %v4155_v59 }
0x2066   :  { %v3431_v57 = vpop.eup %3430 }
0x2067   :  { %1908 = vrot.lane.b32.xlu0 %v3431_v57, %s3485_s20 }
0x20d9   :  { %v1909_v19 = vpop.permute.xlu0 %1908 }
0x20da   :  { %v1911_v38 = vmul.f32 %v3429_v44, %v1909_v19  ;;  %v2100_v19 = vpop.permute.xlu1 %2099 }
0x20db   :  { %vm2101_vm13 = vcmp.ne.s32.totalorder %v2100_v19, 0 }
0x20dc   :  { %1913 = vrot.lane.b32.xlu0 %v1911_v38, %s3486_s21  ;;  %v40_v38 = vld [vmem:[%s4410_s1 + $0x28] sm:$0xff] }
0x214e   :  { %v4160_v56 = vpop.permute.xlu0 %1913 }
0x214f   :  { %3160 = vmatmul.mubr.msk.f32.vlgmr.msra.gmra.mrb[16].mxu1 %vm298_vm3, %v4160_v56 }
0x2150   :  { %3303 = vmatpush3.bf16.msra.mxu1 %v3543_v4  ;;  %3177 = vmatprep.mubr.msk.f32.mxu1 %vm3483_vm1, %v3484_v10 }
0x2151   :  { %3304 = vmatprep.subr.bf16.mxu1 %v3482_v3 }
0x2154   :  { %3306 = vmatpush3.bf16.msra.mxu1 %v3561_v11 }
0x2155   :  { %3175 = vmatprep.subr.mxu1 %v3484_v10 }
0x2158   :  { %3176 = vmatpush3.msk.msra.mxu1 %vm195_vm2, %v4074_v32 }
0x2159   :  { %3191 = vmatprep.subr.mxu1 %v3484_v10 }
0x2222   :  { %v1983_v7 = vpop.f32.mrb[16].mxu1 }
0x2223   :  { %v1987_v50 = vadd.f32 %v1983_v7, %v3678_v58  ;;  %v3161_v62 = vpop.f32.mrb[17].mxu1 }
0x2225   :  { %v2841_v63 = vmul.f32 -1.442695, %v1987_v50 }
0x2227   :  { %3432 = vpow2.f32 %v2841_v63 }
0x2231   :  { %v3433_v53 = vpop.eup %3432 }
0x2232   :  { %v1991_v0 = vadd.f32 1.0, %v3433_v53 }
0x2234   :  { %3434 = vrcp.f32 %v1991_v0 }
0x223e   :  { %v4174_v54 = vpop.eup %3434 }
0x223f   :  { %3165 = vmatmul.mubr.msk.f32.vlgmr.msra.gmra.mrb[24].mxu0 %vm384_vm4, %v4174_v54 }
0x2240   :  { %3309 = vmatpush3.bf16.msra.mxu0 %v3612_v39  ;;  %3188 = vmatprep.mubr.msk.f32.mxu0 %vm3483_vm1, %v3484_v10 }
0x2241   :  { %3310 = vmatprep.subr.bf16.mxu0 %v3482_v3 }
0x2244   :  { %3312 = vmatpush3.bf16.msra.mxu0 %v3618_v41 }
0x2245   :  { %3313 = vmatprep.subr.bf16.mxu0 %v3482_v3 }
0x2312   :  { %v2063_v22 = vpop.f32.mrb[24].mxu0 }
0x2313   :  { %2068 = vrot.lane.b32.xlu0 %v2063_v22, %s3488_s0  ;;  %v3166_v24 = vpop.f32.mrb[25].mxu0 }
0x2317   :  { %2077 = vrot.lane.b32.xlu0 %v2075_v2, %s3488_s0 }
0x2336   :  { %1802 = vmin.xlane.f32.xlu0 %v1801_v37 }
0x2385   :  { %v2069_v43 = vpop.permute.xlu0 %2068 }
0x2386   :  { %v2071_v36 = vadd.f32 %v2069_v43, %v1983_v7 }
0x2389   :  { %v2078_v5 = vpop.permute.xlu0 %2077 }
0x238a   :  { %v2080_v46 = vadd.f32 %v2078_v5, %v2071_v36 }
0x238c   :  { %v2844_v42 = vmul.f32 -1.442695, %v2080_v46 }
0x238e   :  { %3436 = vpow2.f32 %v2844_v42 }
0x2398   :  { %v3437_v44 = vpop.eup %3436 }
0x2399   :  { %v2084_v25 = vadd.f32 1.0, %v3437_v44 }
0x239b   :  { %3438 = vrcp.f32 %v2084_v25 }
0x23a5   :  { %v3439_v12 = vpop.eup %3438 }
0x23a6   :  { %v2087_v45 = vmul.f32 %v3439_v12, %v3707_v31 }
0x23a8   :  { %v2088_v16 = vadd.f32 %v2087_v45, %v3709_v33 }
0x23aa   :  { %2090 = vrot.lane.b32.xlu1 %v2088_v16, %s3487_s17 }
0x23ae   :  { %2103 = vrot.lane.b32.xlu1 %v4132_v29, %s3490_s24 }
0x23c3   :  { %v1803_v30 = vpop.xlane.xlu0 %1802 }
0x23c4   :  { %v1804_v40 = vrot.slane %v1803_v30, 4 }
0x23c6   :  { %v1805_v51 = vmin.f32 %v1803_v30, %v1804_v40  ;;  %v2394_v40 = vsub.s32 4, %v3582_v15 }
0x23c8   :  { %v1806_v6 = vrot.slane %v1805_v51, 2 }
0x23ca   :  { %v1807_v61 = vmin.f32 %v1805_v51, %v1806_v6 }
0x23cc   :  { %v1808_v55 = vrot.slane %v1807_v61, 1 }
0x23ce   :  { %v1809_v57 = vmin.f32 %v1807_v61, %v1808_v55  ;;  %v2395_v61 = vrot.slane %v3843_v52, %v2394_v40 }
0x23d0   :  { %3337 = vpush %v1809_v57 }
0x2401   :  { %s3338_s15 = spop %3337 }
0x2402   :  { %v1811_v7 = vstv %s3338_s15 }
0x2403   :  { %vm4210_vm14 = vcmp.lt.f32.partialorder %v1811_v7, 0.0 }
0x241c   :  { %v2091_v50 = vpop.permute.xlu1 %2090 }
0x241d   :  { %vm2093_vm7 = vcmp.lt.f32.partialorder %v40_v38, %v2091_v50 }
0x241e   :  { %vm2095_vm11 = vmand %vm2093_vm7, %vm2094_vm5 }
0x241f   :  { %v2096_v63 = vsel %vm2095_vm11, %v4174_v54, %v4124_v23  ;;  %vm2102_vm15 = vmand %vm2093_vm7, %vm2101_vm13 }
0x2420   :  { %v2104_v53 = vpop.permute.xlu1 %2103  ;;  %v4220_v0 = vsel %vm4210_vm14, %v2096_v63, %v4124_v23  ;;  %v181_v23 = vadd.f32 %v3701_v9, %v3593_v18  ;;  %v4245_v9 = vsel %vm4210_vm14, %v4155_v59, %v4152_v60  ;;  %vm2108_vm5 = vmand %vm2107_vm0, %vm2093_vm7 }
0x2421   :  { %v2106_v17 = vsel %vm2102_vm15, 1.0, %v2104_v53  ;;  %v2109_v60 = vsel %vm2108_vm5, 5.0, %v4196_v49  ;;  %vm2414_vm11 = vcmp.eq.f32.partialorder %v4220_v0, 0.0 }
0x2422   :  { %2112 = vrot.lane.b32.xlu1 %v2106_v17, %s3486_s21  ;;  %v4262_v59 = vsel %vm4210_vm14, %v2109_v60, %v4196_v49 }
0x2423   :  { %v2121_v55 = vsel %vm384_vm4, %v4262_v59, inf }
0x2494   :  { %v2113_v22 = vpop.permute.xlu1 %2112 }
0x2495   :  { %v2115_v24 = vsel %vm298_vm3, %v4160_v56, %v2113_v22 }
0x2496   :  { %v4228_v2 = vsel %vm4210_vm14, %v2115_v24, %v4132_v29 }
0x2497   :  { %3178 = vmatmul.mubr.msk.f32.vlgmr.msra.gmra.mrb[18].mxu1 %vm191_vm6, %v4228_v2  ;;  %vm2417_vm7 = vcmp.eq.f32.partialorder %v4228_v2, 0.0 }
0x2498   :  { %3192 = vmatpush3.msk.msra.mxu1 %vm195_vm2, %v3647_v48  ;;  %3193 = vmatprep.mubr.msk.f32.mxu1 %vm3483_vm1, %v3484_v10 }
0x2499   :  { %3319 = vmatprep.subr.bf16.mxu1 %v3482_v3 }
0x256a   :  { %v2202_v56 = vpop.f32.mrb[18].mxu1 }
0x256b   :  { %v2206_v28 = vadd.f32 %v2202_v56, %v181_v23  ;;  %v3179_v37 = vpop.f32.mrb[19].mxu1 }
0x256c   :  { %v2418_v37 = vsel %vm2417_vm7, 1, %v3489_v14 }
0x256d   :  { %v2847_v43 = vmul.f32 -1.442695, %v2206_v28 }
0x256f   :  { %3440 = vpow2.f32 %v2847_v43 }
0x2579   :  { %v3441_v29 = vpop.eup %3440 }
0x257a   :  { %v2210_v36 = vadd.f32 1.0, %v3441_v29 }
0x257c   :  { %3442 = vrcp.f32 %v2210_v36 }
0x2586   :  { %v3443_v5 = vpop.eup %3442 }
0x2587   :  { %v2213_v46 = vmul.f32 2.0, %v3443_v5  ;;  %v2215_v12 = vmul.f32 %v3443_v5, %v4245_v9 }
0x2589   :  { %v2848_v42 = vadd.f32 -1.0, %v2213_v46 }
0x258b   :  { %2217 = vrot.lane.b32.xlu1 %v2848_v42, %s3485_s20 }
0x25fd   :  { %v2218_v44 = vpop.permute.xlu1 %2217 }
0x25fe   :  { %v2220_v25 = vmul.f32 %v3443_v5, %v2218_v44  ;;  %v4301_v44 = vld [vmem:[%s4410_s1 + $0x30] sm:$0xff] }
0x2600   :  { %2222 = vrot.lane.b32.xlu1 %v2220_v25, %s3486_s21 }
0x2672   :  { %v2223_v45 = vpop.permute.xlu1 %2222 }
0x2673   :  { %v4248_v16 = vadd.f32 %v2223_v45, %v2215_v12 }
0x2675   :  { %3444 = vtanh.f32 %v4248_v16 }
0x267f   :  { %v3445_v30 = vpop.eup %3444 }
0x2680   :  { %2228 = vrot.lane.b32.xlu1 %v3445_v30, %s3485_s20 }
0x26f2   :  { %v2229_v51 = vpop.permute.xlu1 %2228 }
0x26f3   :  { %v2231_v6 = vmul.f32 %v3443_v5, %v2229_v51 }
0x26f5   :  { %2233 = vrot.lane.b32.xlu1 %v2231_v6, %s3486_s21 }
0x26f9   :  { %2397 = vrot.lane.b32.xlu1 %v2395_v61, %s3488_s0 }
0x271d   :  { %2122 = vmin.xlane.f32.xlu1 %v2121_v55 }
0x2767   :  { %v4266_v57 = vpop.permute.xlu1 %2233 }
0x2768   :  { %3189 = vmatmul.mubr.msk.f32.vlgmr.msra.gmra.mrb[26].mxu0 %vm298_vm3, %v4266_v57 }
0x2769   :  { %3315 = vmatpush3.bf16.msra.mxu0 %v3543_v4  ;;  %3206 = vmatprep.mubr.msk.f32.mxu0 %vm3483_vm1, %v3484_v10 }
0x276a   :  { %3316 = vmatprep.subr.bf16.mxu0 %v3482_v3 }
0x276b   :  { %v2398_v52 = vpop.permute.xlu1 %2397 }
0x276d   :  { %3318 = vmatpush3.bf16.msra.mxu0 %v3561_v11 }
0x276e   :  { %3204 = vmatprep.subr.mxu0 %v3484_v10 }
0x2771   :  { %3205 = vmatpush3.msk.msra.mxu0 %vm195_vm2, %v4074_v32 }
0x2772   :  { %3220 = vmatprep.subr.mxu0 %v3484_v10 }
0x27aa   :  { %v2123_v49 = vpop.xlane.xlu1 %2122 }
0x27ab   :  { %v2124_v19 = vrot.slane %v2123_v49, 4 }
0x27ad   :  { %v2125_v38 = vmin.f32 %v2123_v49, %v2124_v19 }
0x27af   :  { %v2126_v7 = vrot.slane %v2125_v38, 2 }
0x27b1   :  { %v2127_v4 = vmin.f32 %v2125_v38, %v2126_v7 }
0x27b3   :  { %v2128_v50 = vrot.slane %v2127_v4, 1 }
0x27b5   :  { %v2129_v63 = vmin.f32 %v2127_v4, %v2128_v50 }
0x27b7   :  { %3339 = vpush %v2129_v63 }
0x27e8   :  { %s3340_s19 = spop %3339 }
0x27e9   :  { %v2131_v25 = vstv %s3340_s19 }
0x27ea   :  { %vm4311_vm0 = vcmp.lt.f32.partialorder %v2131_v25, 0.0 }
0x283b   :  { %v2303_v53 = vpop.f32.mrb[26].mxu0 }
0x283c   :  { %v2307_v17 = vadd.f32 %v2303_v53, %v3678_v58  ;;  %v3190_v11 = vpop.f32.mrb[27].mxu0 }
0x283e   :  { %v2850_v22 = vmul.f32 -1.442695, %v2307_v17 }
0x2840   :  { %3446 = vpow2.f32 %v2850_v22 }
0x284a   :  { %v3447_v24 = vpop.eup %3446 }
0x284b   :  { %v2311_v23 = vadd.f32 1.0, %v3447_v24 }
0x284d   :  { %3448 = vrcp.f32 %v2311_v23  ;;  %v2714_v23 = vsub.s32 5, %v3582_v15 }
0x2857   :  { %v4280_v32 = vpop.eup %3448 }
0x2858   :  { %3194 = vmatmul.mubr.msk.f32.vlgmr.msra.gmra.mrb[20].mxu1 %vm384_vm4, %v4280_v32 }
0x2859   :  { %3321 = vmatpush3.bf16.msra.mxu1 %v3612_v39  ;;  %3217 = vmatprep.mubr.msk.f32.mxu1 %vm3483_vm1, %v3484_v10 }
0x285a   :  { %3322 = vmatprep.subr.bf16.mxu1 %v3482_v3 }
0x285d   :  { %3324 = vmatpush3.bf16.msra.mxu1 %v3618_v41 }
0x292b   :  { %v2383_v56 = vpop.f32.mrb[20].mxu1 }
0x292c   :  { %2388 = vrot.lane.b32.xlu0 %v2383_v56, %s3488_s0  ;;  %v3195_v28 = vpop.f32.mrb[21].mxu1 }
0x2930   :  { %2419 = vrot.lane.b32.xlu0 %v2418_v37, %s3490_s24 }
0x299e   :  { %v2389_v43 = vpop.permute.xlu0 %2388 }
0x299f   :  { %v2391_v29 = vadd.f32 %v2389_v43, %v2303_v53 }
0x29a1   :  { %v2400_v39 = vadd.f32 %v2398_v52, %v2391_v29 }
0x29a2   :  { %v2420_v14 = vpop.permute.xlu0 %2419 }
0x29a3   :  { %v2853_v36 = vmul.f32 -1.442695, %v2400_v39  ;;  %vm2421_vm5 = vcmp.ne.s32.totalorder %v2420_v14, 0 }
0x29a5   :  { %3450 = vpow2.f32 %v2853_v36 }
0x29af   :  { %v3451_v5 = vpop.eup %3450 }
0x29b0   :  { %v2404_v46 = vadd.f32 1.0, %v3451_v5 }
0x29b2   :  { %3452 = vrcp.f32 %v2404_v46 }
0x29bc   :  { %v3453_v3 = vpop.eup %3452 }
0x29bd   :  { %v2407_v41 = vmul.f32 %v3453_v3, %v3707_v31 }
0x29bf   :  { %v2408_v42 = vadd.f32 %v2407_v41, %v3709_v33 }
0x29c1   :  { %2410 = vrot.lane.b32.xlu0 %v2408_v42, %s3487_s17 }
0x29c5   :  { %2423 = vrot.lane.b32.xlu0 %v4228_v2, %s3490_s24 }
0x2a33   :  { %v4303_v12 = vpop.permute.xlu0 %2410 }
0x2a34   :  { %vm2413_vm13 = vcmp.lt.f32.partialorder %v4301_v44, %v4303_v12 }
0x2a35   :  { %vm2415_vm15 = vmand %vm2413_vm13, %vm2414_vm11 }
0x2a36   :  { %v2416_v30 = vsel %vm2415_vm15, %v4280_v32, %v4220_v0  ;;  %vm2422_vm7 = vmand %vm2413_vm13, %vm2421_vm5 }
0x2a37   :  { %v2424_v40 = vpop.permute.xlu0 %2423  ;;  %v4323_v51 = vsel %vm4311_vm0, %v2416_v30, %v4220_v0  ;;  %v186_v0 = vadd.f32 %v3699_v8, %v3593_v18 }
0x2a38   :  { %v2426_v6 = vsel %vm2422_vm7, 1.0, %v2424_v40 }
0x2a39   :  { %2432 = vrot.lane.b32.xlu0 %v2426_v6, %s3486_s21 }
0x2aab   :  { %v2433_v61 = vpop.permute.xlu0 %2432 }
0x2aac   :  { %v2435_v60 = vsel %vm298_vm3, %v4266_v57, %v2433_v61 }
0x2aad   :  { %v2436_v55 = vsel %vm4311_vm0, %v2435_v60, %v4228_v2 }
0x2aae   :  { %3207 = vmatmul.mubr.msk.f32.vlgmr.msra.gmra.mrb[28].mxu0 %vm191_vm6, %v2436_v55 }
0x2aaf   :  { %3221 = vmatpush3.msk.msra.mxu0 %vm195_vm2, %v3647_v48  ;;  %3222 = vmatprep.mubr.msk.f32.mxu0 %vm3483_vm1, %v3484_v10  ;;  %v2437_v10 = vsel %vm4311_vm0, %v4248_v16, %v4245_v9  ;;  %v3469_v9 = vld [vmem:[%s4414_s5 + $0x8] sm:$0x3f]  ;;  %vm2427_vm1 = vcmp.eq.f32.partialorder %v4262_v59, -1.0 }
0x2ab0   :  { %v2715_v16 = vrot.slane %v3469_v9, %v2714_v23  ;;  %vm2428_vm2 = vmand %vm2427_vm1, %vm2413_vm13 }
0x2b81   :  { %v2522_v52 = vpop.f32.mrb[28].mxu0 }
0x2b82   :  { %v2526_v49 = vadd.f32 %v2522_v52, %v186_v0  ;;  %v3208_v19 = vpop.f32.mrb[29].mxu0 }
0x2b84   :  { %v2856_v38 = vmul.f32 -1.442695, %v2526_v49 }
0x2b86   :  { %3454 = vpow2.f32 %v2856_v38  ;;  %v42_v38 = vld [vmem:[%s4410_s1 + $0x38] sm:$0xff] }
0x2b90   :  { %v3455_v57 = vpop.eup %3454 }
0x2b91   :  { %v2530_v7 = vadd.f32 1.0, %v3455_v57 }
0x2b93   :  { %3456 = vrcp.f32 %v2530_v7 }
0x2b9d   :  { %v3457_v2 = vpop.eup %3456 }
0x2b9e   :  { %v2533_v4 = vmul.f32 2.0, %v3457_v2  ;;  %v2535_v18 = vmul.f32 %v3457_v2, %v2437_v10 }
0x2ba0   :  { %v2857_v50 = vadd.f32 -1.0, %v2533_v4 }
0x2ba2   :  { %2537 = vrot.lane.b32.xlu0 %v2857_v50, %s3485_s20 }
0x2c14   :  { %v2538_v48 = vpop.permute.xlu0 %2537 }
0x2c15   :  { %v2540_v63 = vmul.f32 %v3457_v2, %v2538_v48 }
0x2c17   :  { %2542 = vrot.lane.b32.xlu1 %v2540_v63, %s3486_s21 }
0x2c89   :  { %v2543_v8 = vpop.permute.xlu1 %2542 }
0x2c8a   :  { %v2545_v53 = vadd.f32 %v2543_v8, %v2535_v18 }
0x2c8c   :  { %3458 = vtanh.f32 %v2545_v53 }
0x2c96   :  { %v3459_v17 = vpop.eup %3458 }
0x2c97   :  { %2548 = vrot.lane.b32.xlu0 %v3459_v17, %s3485_s20 }
0x2d09   :  { %v2549_v11 = vpop.permute.xlu0 %2548 }
0x2d0a   :  { %v2551_v22 = vmul.f32 %v3457_v2, %v2549_v11 }
0x2d0c   :  { %2553 = vrot.lane.b32.xlu0 %v2551_v22, %s3486_s21 }
0x2d10   :  { %2717 = vrot.lane.b32.xlu0 %v2715_v16, %s3488_s0 }
0x2d7e   :  { %v2554_v24 = vpop.permute.xlu0 %2553 }
0x2d7f   :  { %3218 = vmatmul.mubr.msk.f32.vlgmr.msra.gmra.mrb[22].mxu1 %vm298_vm3, %v2554_v24  ;;  %vm2734_vm3 = vcmp.eq.f32.partialorder %v4323_v51, 0.0 }
0x2d82   :  { %v2718_v41 = vpop.permute.xlu0 %2717 }
0x2e52   :  { %v2623_v56 = vpop.f32.mrb[22].mxu1 }
0x2e53   :  { %v2627_v28 = vadd.f32 %v2623_v56, %v3678_v58  ;;  %v3219_v37 = vpop.f32.mrb[23].mxu1  ;;  %v2429_v58 = vsel %vm2428_vm2, 6.0, %v4262_v59 }
0x2e54   :  { %v2439_v46 = vsel %vm4311_vm0, %v2429_v58, %v4262_v59 }
0x2e55   :  { %v2859_v43 = vmul.f32 -1.442695, %v2627_v28  ;;  %v2441_v3 = vsel %vm384_vm4, %v2439_v46, inf  ;;  %vm2737_vm13 = vcmp.eq.f32.partialorder %v2439_v46, -1.0 }
0x2e57   :  { %3460 = vpow2.f32 %v2859_v43 }
0x2e61   :  { %v3461_v29 = vpop.eup %3460 }
0x2e62   :  { %v2631_v39 = vadd.f32 1.0, %v3461_v29 }
0x2e64   :  { %3462 = vrcp.f32 %v2631_v39 }
0x2e6e   :  { %v3463_v36 = vpop.eup %3462 }
0x2e6f   :  { %3223 = vmatmul.mubr.msk.f32.vlgmr.msra.gmra.mrb[30].mxu0 %vm384_vm4, %v3463_v36 }
0x2f42   :  { %v2703_v15 = vpop.f32.mrb[30].mxu0 }
0x2f43   :  { %2708 = vrot.lane.b32.xlu0 %v2703_v15, %s3488_s0  ;;  %v3224_v5 = vpop.f32.mrb[31].mxu0 }
0x2f62   :  { %2442 = vmin.xlane.f32.xlu0 %v2441_v3 }
0x2fb5   :  { %v2709_v42 = vpop.permute.xlu0 %2708 }
0x2fb6   :  { %v2711_v14 = vadd.f32 %v2709_v42, %v2623_v56 }
0x2fb8   :  { %v2720_v25 = vadd.f32 %v2718_v41, %v2711_v14 }
0x2fba   :  { %v2862_v30 = vmul.f32 -1.442695, %v2720_v25 }
0x2fbc   :  { %3464 = vpow2.f32 %v2862_v30 }
0x2fc6   :  { %v3465_v40 = vpop.eup %3464 }
0x2fc7   :  { %v2724_v6 = vadd.f32 1.0, %v3465_v40 }
0x2fc9   :  { %3466 = vrcp.f32 %v2724_v6 }
0x2fd3   :  { %v3467_v44 = vpop.eup %3466 }
0x2fd4   :  { %v2727_v12 = vmul.f32 %v3467_v44, %v3707_v31  ;;  %v840_v31 = vsel %vm3800_vm12, %v3769_v27, %v3681_v1 }
0x2fd5   :  { %v1160_v57 = vsel %vm3906_vm9, %v3874_v26, %v840_v31 }
0x2fd6   :  { %v2728_v61 = vadd.f32 %v2727_v12, %v3709_v33  ;;  %v1480_v2 = vsel %vm4005_vm10, %v3968_v47, %v1160_v57 }
0x2fd7   :  { %v1800_v4 = vsel %vm4112_vm8, %v4080_v13, %v1480_v2 }
0x2fd8   :  { %2730 = vrot.lane.b32.xlu1 %v2728_v61, %s3487_s17  ;;  %v2120_v1 = vsel %vm4210_vm14, %v4174_v54, %v1800_v4 }
0x2fd9   :  { %v2440_v20 = vsel %vm4311_vm0, %v4280_v32, %v2120_v1 }
0x2fef   :  { %v2443_v59 = vpop.xlane.xlu0 %2442 }
0x2ff0   :  { %v2444_v60 = vrot.slane %v2443_v59, 4 }
0x2ff2   :  { %v2445_v55 = vmin.f32 %v2443_v59, %v2444_v60 }
0x2ff4   :  { %v2446_v0 = vrot.slane %v2445_v55, 2 }
0x2ff6   :  { %v2447_v52 = vmin.f32 %v2445_v55, %v2446_v0 }
0x2ff8   :  { %v2448_v49 = vrot.slane %v2447_v52, 1 }
0x2ffa   :  { %v2449_v19 = vmin.f32 %v2447_v52, %v2448_v49 }
0x2ffc   :  { %3341 = vpush %v2449_v19 }
0x302d   :  { %s3342_s5 = spop %3341 }
0x302e   :  { %v2451_v33 = vstv %s3342_s5 }
0x302f   :  { %vm2452_vm11 = vcmp.lt.f32.partialorder %v2451_v33, 0.0 }
0x3030   :  { %v2742_v47 = vsel %vm2452_vm11, %v3463_v36, %v2440_v20 }
0x304a   :  { %v2731_v7 = vpop.permute.xlu1 %2730 }
0x304b   :  { %vm2733_vm6 = vcmp.lt.f32.partialorder %v42_v38, %v2731_v7 }
0x304c   :  { %vm2735_vm12 = vmand %vm2733_vm6, %vm2734_vm3 }
0x304d   :  { %v2736_v27 = vsel %vm2735_vm12, %v3463_v36, %v4323_v51  ;;  %vm2738_vm9 = vmand %vm2737_vm13, %vm2733_vm6 }
0x304e   :  { %v2739_v26 = vsel %vm2738_vm9, 7.0, %v2439_v46  ;;  %v2740_v35 = vsel %vm2452_vm11, %v2736_v27, %v4323_v51 }
0x304f   :  { %vm2743_vm10 = vcmp.eq.f32.partialorder %v2740_v35, 0.0  ;;  %v2741_v34 = vsel %vm2452_vm11, %v2739_v26, %v2439_v46 }
0x3050   :  { %v2744_v13 = vsel %vm2743_vm10, %v2742_v47, %v2740_v35  ;;  %vm2745_vm8 = vcmp.eq.f32.partialorder %v2741_v34, -1.0 }
0x3051   :  { %2747 = vst.msk [vmem:[%s4415_s6] sm:$0xff] %vm384_vm4, %v2744_v13  ;;  %v2746_v21 = vsel %vm2745_vm8, 7.0, %v2741_v34  ;;  %s3470_s6 = scalar_lea.hbm %s4416_s7, 16 }
0x3052   :  { %v2748_v54 = vadd.f32 1.0, %v2746_v21  ;;  %p3471_p0 = scmp.ne.s32.totalorder %s4416_s7, %s3470_s6  ;;  %p3474_p1 = scmp.lt.u32.totalorder %s3470_s6, %s4416_s7 }
0x3054   :  { %v2749_v62 = vsel %vm384_vm4, %v2748_v54, 0.0  ;;  %p3476_p2 = pnand %p3474_p1, %p3471_p0 }
0x3055   :  { %2750 = vadd.xlane.f32.xlu1 %v2749_v62 }
0x30e2   :  { %v2751_v45 = vpop.xlane.xlu1 %2750 }
0x30e3   :  { %v2752_v32 = vrot.slane %v2751_v45, 4 }
0x30e5   :  { %v2753_v50 = vadd.f32 %v2752_v32, %v2751_v45 }
0x30e7   :  { %v2754_v48 = vrot.slane %v2753_v50, 2 }
0x30e9   :  { %v2755_v51 = vadd.f32 %v2754_v48, %v2753_v50 }
0x30eb   :  { %v2756_v63 = vrot.slane %v2755_v51, 1 }
0x30ed   :  { %v2757_v10 = vadd.f32 %v2756_v63, %v2755_v51 }
0x30ef   :  { %3343 = vpush %v2757_v10 }
0x3120   :  { %s3344_s0 = spop %3343 }
0x3121   :  { %s2761_s26 = smul.f32 0.03125, %s3344_s0 }
0x3123   :  { %s2764_s27 = smul.f32 0.11111111, %s2761_s26 }
0x3125   :  { %2766 = sst [smem:[#allocation2]] %s2764_s27 }
0x3126   :  { %3479 = shalt.err (!%p3476_p2)
}
0x3127   :  { %s3492_s10 = smov [#allocation2]  }
0x3128   :  { %2776 = dma.smem_to_hbm %s3492_s10, 16, %s4416_s7, [#allocation3]  }
0x3129   :  { %3480 = dma.done.wait [#allocation3], 16  }
0x312a   :  { %3481 = vsyncadd [#allocation3], 4294967280 }
0x312b   :  { %2782 = sfence }
0x312c   :  { %2783 = vsyncpa [#allocation3], 1 }

</bundles_post_ra>
